<compile_context>
chip_gen: v6e
topology: v6e:2x2x1
jax: 0.10.0
libtpu: 0.0.40
codegen_flags: <defaults>
</compile_context>

<pallas_src>
import functools

import jax
import jax.numpy as jnp
from jax.experimental import pallas as pl
from jax.experimental.pallas import tpu as pltpu

KERNEL_SIZE = 5
PADDING = 2
STRIDE = 2
BN_EPS = 1e-5
# Lane padding for the MXU rhs / per-channel vectors only (the stored tensors are
# un-padded).  128 exactly fills v5e's 4x128^2 MXU; when a real config has
# C_out >= 128, prefer 256-wide tiles on v6e/v7x (2x256^2 MXU) — derive from
# pltpu.get_tpu_info() in that case.
C_PAD = 128
R_OFF = (KERNEL_SIZE + STRIDE - 1) // STRIDE      # 3 row/col offsets per parity phase
N_PHASE = STRIDE * STRIDE                         # 4 stride-2 parity phases


def _conv_tile(w_ref, xph_ref, lhs_ref, oh0, *, th, w_out, c_in):
    """Assemble the folded-K lhs for one (th x w_out) output tile into a VMEM scratch
    and run a single bf16 matmul with f32 accumulation on the MXU.

    K layout = (row offset r, col offset c, parity phase, c_in): 9 wide slices of the
    merged-phase tile (each covering all 4 phases / 4*c_in lanes at once) replace the
    previous 25 narrow slice+reshape+dot chains.  Taps outside the 5x5 kernel
    (e.g. r == 2 with an odd ki) have zero weight rows, so their lhs columns are inert.
    """
    m = th * w_out
    c4 = N_PHASE * c_in
    k_used = R_OFF * R_OFF * c4
    k_pad = lhs_ref.shape[1]
    if k_pad > k_used:
        # keep the zero-weight K padding columns at exactly 0 (scratch is uninitialized,
        # and this must hold on every core under megacore sharding)
        lhs_ref[:, pl.ds(k_used, k_pad - k_used)] = jnp.zeros(
            (m, k_pad - k_used), lhs_ref.dtype)
    for r in range(R_OFF):
        for c in range(R_OFF):
            win = xph_ref[0, pl.ds(oh0 + r, th), pl.ds(c, w_out), :]   # (th, w_out, c4)
            lhs_ref[:, pl.ds((r * R_OFF + c) * c4, c4)] = win.reshape(m, c4)
    return jnp.dot(lhs_ref[...], w_ref[...], preferred_element_type=jnp.float32)


def conv_stats_kernel(w_ref, xph_ref, stats_ref, lhs_ref, *, th, w_out, c_in):
    """Pass 1, grid=(N, H_out//th); all steps independent (no serial accumulator).
    Emits per-tile channel sum and tile-mean-centered sum of squares; the wrapper
    combines them with Chan's parallel-variance formula (no E[y^2]-mean^2 cancel)."""
    oh0 = pl.multiple_of(pl.program_id(1) * th, th)
    y = _conv_tile(w_ref, xph_ref, lhs_ref, oh0, th=th, w_out=w_out, c_in=c_in)
    s = jnp.sum(y, axis=0, keepdims=True)                        # (1, C_PAD)
    mu = s * (1.0 / (th * w_out))
    d = y - mu
    m2 = jnp.sum(d * d, axis=0, keepdims=True)                   # (1, C_PAD)
    stats_ref[0, 0:1, :] = s                                     # two direct row writes,
    stats_ref[0, 1:2, :] = m2                                    # no broadcast/concat


def conv_bn_relu_kernel(w_ref, xph_ref, scale_ref, shift_ref, o_ref, lhs_ref,
                        *, th, w_out, c_in, c_out):
    """Pass 2: recompute the cheap conv tile (no f32 y round trip through HBM), apply
    the precomputed BN affine + ReLU, and write the final un-padded NHWC tile."""
    oh0 = pl.multiple_of(pl.program_id(1) * th, th)
    y = _conv_tile(w_ref, xph_ref, lhs_ref, oh0, th=th, w_out=w_out, c_in=c_in)
    z = jnp.maximum(y * scale_ref[...] + shift_ref[...], 0.0)
    # store only the real C_out channels (~16x less HBM than the old 128-padded y)
    o_ref[0] = z[:, :c_out].reshape(th, w_out, c_out)


def _pick_tile_rows(n, h_out, w_out, max_rows=256, min_steps=4):
    """Largest divisor of h_out whose tile (th*w_out rows) stays <= max_rows, preferring
    enough total grid steps for megacore sharding / pipeline depth."""
    divisors = [d for d in range(1, h_out + 1) if h_out % d == 0]
    fits = [d for d in divisors if d * w_out <= max_rows] or [1]
    good = [d for d in fits if n * (h_out // d) >= min_steps]
    return max(good) if good else max(fits)


def encoder_block_forward(x, w, gamma, beta):
    """x: (N, C_in, H, W) NCHW f32; w: (C_out, C_in, 5, 5); gamma/beta: (C_out,)."""
    N, C_in, H, W = x.shape
    C_out = w.shape[0]
    KH = KW = KERNEL_SIZE
    H_out = (H + 2 * PADDING - KH) // STRIDE + 1
    W_out = (W + 2 * PADDING - KW) // STRIDE + 1
    M = N * H_out * W_out
    c4 = N_PHASE * C_in
    K_used = R_OFF * R_OFF * c4
    K_pad = ((K_used + C_PAD - 1) // C_PAD) * C_PAD

    th = _pick_tile_rows(N, H_out, W_out)
    T = H_out // th
    m_tile = th * W_out
    G = N * T

    # ---- input: NCHW -> NHWC bf16, spatial zero-pad, stride-2 parity phases merged
    # onto the lane axis -> one (N, Hp, Wp, 4*C_in) array, one DMA stream per step.
    x_nhwc = jnp.transpose(x, (0, 2, 3, 1)).astype(jnp.bfloat16)
    xp = jnp.pad(x_nhwc, ((0, 0), (PADDING, PADDING), (PADDING, PADDING), (0, 0)))
    Hp = H_out + (KH - 1) // STRIDE
    Wp = W_out + (KW - 1) // STRIDE
    phases = []
    for pi in range(STRIDE):
        for pj in range(STRIDE):
            ph = xp[:, pi::STRIDE, pj::STRIDE, :]
            ph = jnp.pad(ph, ((0, 0), (0, Hp - ph.shape[1]),
                              (0, Wp - ph.shape[2]), (0, 0)))
            phases.append(ph)
    xph = jnp.concatenate(phases, axis=-1)                 # (N, Hp, Wp, 4*C_in)

    # ---- weights folded to a single (K_pad, C_PAD) rhs matching the lhs K layout
    # K index = ((r*3 + c)*4 + pi*2 + pj)*C_in + ci ; taps with ki/kj == 5 are zero.
    w_t = jnp.transpose(w, (2, 3, 1, 0))                   # (KH, KW, C_in, C_out)
    w6 = jnp.pad(w_t, ((0, 1), (0, 1), (0, 0), (0, 0)))    # zero rows/cols for tap 5
    w_r = w6.reshape(R_OFF, STRIDE, R_OFF, STRIDE, C_in, C_out)
    w_r = jnp.transpose(w_r, (0, 2, 1, 3, 4, 5)).reshape(K_used, C_out)
    w_fold = jnp.pad(w_r, ((0, K_pad - K_used), (0, C_PAD - C_out))).astype(jnp.bfloat16)

    # Explicit VMEM cap (v7x scoped default is 32 MiB of 64 MiB physical); per-step
    # usage here is well under 1 MiB.  For very large images switch the xph block to a
    # windowed (Element-indexed) row slab instead of the whole padded image.
    cparams = pltpu.CompilerParams(
        dimension_semantics=("parallel", "arbitrary"),
        vmem_limit_bytes=32 * 1024 * 1024)

    # ---- pass 1: conv tiles -> per-tile BN statistics only (y never hits HBM)
    stats = pl.pallas_call(
        functools.partial(conv_stats_kernel, th=th, w_out=W_out, c_in=C_in),
        out_shape=jax.ShapeDtypeStruct((G, 2, C_PAD), jnp.float32),
        grid_spec=pltpu.PrefetchScalarGridSpec(
            num_scalar_prefetch=0,
            grid=(N, T),
            in_specs=[pl.BlockSpec((K_pad, C_PAD), lambda n, t: (0, 0)),
                      pl.BlockSpec((1, Hp, Wp, c4), lambda n, t: (n, 0, 0, 0))],
            out_specs=pl.BlockSpec((1, 2, C_PAD), lambda n, t: (n * T + t, 0, 0)),
            scratch_shapes=[pltpu.VMEM((m_tile, K_pad), jnp.bfloat16)]),
        compiler_params=cparams,
    )(w_fold, xph)

    # ---- tiny (C_PAD,) reduction: Chan parallel-variance combine, then scale/shift
    inv_m = 1.0 / float(M)
    sums = stats[:, 0, :]                                  # (G, C_PAD) per-tile sums
    m2s = stats[:, 1, :]                                   # per-tile centered sum-sq
    mean = jnp.sum(sums, axis=0) * inv_m
    mu_t = sums * (1.0 / float(m_tile))
    var = (jnp.sum(m2s, axis=0)
           + float(m_tile) * jnp.sum((mu_t - mean) ** 2, axis=0)) * inv_m
    var = jnp.maximum(var, 0.0)
    gamma_p = jnp.pad(gamma.astype(jnp.float32), (0, C_PAD - C_out))
    beta_p = jnp.pad(beta.astype(jnp.float32), (0, C_PAD - C_out))
    scale = (gamma_p * jax.lax.rsqrt(var + BN_EPS)).reshape(1, C_PAD)
    shift = (beta_p - mean * scale[0]).reshape(1, C_PAD)
    # TODO(synk): BatchNorm2d running_mean/running_var (momentum=0.9) are not updated;
    # the training-mode forward output depends only on batch statistics.

    # ---- pass 2: recompute conv tile + fused BN affine + ReLU, un-padded NHWC output
    out_nhwc = pl.pallas_call(
        functools.partial(conv_bn_relu_kernel, th=th, w_out=W_out,
                          c_in=C_in, c_out=C_out),
        out_shape=jax.ShapeDtypeStruct((N, H_out, W_out, C_out), jnp.float32),
        grid_spec=pltpu.PrefetchScalarGridSpec(
            num_scalar_prefetch=0,
            grid=(N, T),
            in_specs=[pl.BlockSpec((K_pad, C_PAD), lambda n, t: (0, 0)),
                      pl.BlockSpec((1, Hp, Wp, c4), lambda n, t: (n, 0, 0, 0)),
                      pl.BlockSpec((1, C_PAD), lambda n, t: (0, 0)),
                      pl.BlockSpec((1, C_PAD), lambda n, t: (0, 0))],
            out_specs=pl.BlockSpec((1, th, W_out, C_out), lambda n, t: (n, t, 0, 0)),
            scratch_shapes=[pltpu.VMEM((m_tile, K_pad), jnp.bfloat16)]),
        compiler_params=cparams,
    )(w_fold, xph, scale, shift)

    # NHWC -> NCHW (module contract); data is already un-padded.
    return jnp.transpose(out_nhwc, (0, 3, 1, 2))


def reference(x, w, gamma, beta):
    conv = jax.lax.conv_general_dilated(
        x, w, window_strides=(STRIDE, STRIDE),
        padding=[(PADDING, PADDING), (PADDING, PADDING)],
        dimension_numbers=("NCHW", "OIHW", "NCHW"))
    mean = conv.mean(axis=(0, 2, 3), keepdims=True)
    var = conv.var(axis=(0, 2, 3), keepdims=True)
    g = gamma.reshape(1, -1, 1, 1)
    b = beta.reshape(1, -1, 1, 1)
    return jax.nn.relu((conv - mean) * jax.lax.rsqrt(var + BN_EPS) * g + b)


if __name__ == "__main__":
    key = jax.random.PRNGKey(0)
    k1, k2, k3, k4 = jax.random.split(key, 4)

    N, C_in, H, W = 2, 4, 16, 16
    C_out = 8

    x = jax.random.normal(k1, (N, C_in, H, W), jnp.float32)
    w = 0.1 * jax.random.normal(k2, (C_out, C_in, KERNEL_SIZE, KERNEL_SIZE), jnp.float32)
    gamma = 1.0 + 0.1 * jax.random.normal(k3, (C_out,), jnp.float32)
    beta = 0.1 * jax.random.normal(k4, (C_out,), jnp.float32)

    # bf16-round the matmul operands once so the kernel (bf16 MXU stream, f32 accum)
    # and the f32 reference see identical inputs.
    x_q = x.astype(jnp.bfloat16).astype(jnp.float32)
    w_q = w.astype(jnp.bfloat16).astype(jnp.float32)

    out = jax.block_until_ready(jax.jit(encoder_block_forward)(x_q, w_q, gamma, beta))
    ref = reference(x_q, w_q, gamma, beta)

    assert out.shape == ref.shape, (out.shape, ref.shape)
    err = float(jnp.max(jnp.abs(out - ref)))
    assert err < 2e-3, f"max abs error {err}"
    print("KERNEL_OK")
</pallas_src>

<mosaic_0001>
module attributes {stable_mosaic.version = 11 : i64} {
  func.func @conv_stats_kernel(%arg0: i32, %arg1: i32, %arg2: memref<256x128xbf16, #tpu.memory_space<vmem>>, %arg3: memref<1x10x10x16xbf16, #tpu.memory_space<vmem>>, %arg4: memref<1x2x128xf32, #tpu.memory_space<vmem>>, %arg5: memref<32x256xbf16, #tpu.memory_space<vmem>>) attributes {dimension_semantics = [#tpu.dimension_semantics<parallel>, #tpu.dimension_semantics<arbitrary>], iteration_bounds = array<i64: 2, 2>, scalar_prefetch = 0 : i64, scratch_operands = 1 : i64, tpu.core_type = #tpu.core_type<tc>, window_params = [{pipeline_mode = #tpu.pipeline_mode<synchronous>, transform_indices = @transform_0, window_bounds = array<i64: 256, 128>}, {transform_indices = @transform_1, window_bounds = array<i64: 1, 10, 10, 16>}, {transform_indices = @transform_2, window_bounds = array<i64: 1, 2, 128>}]} {
    %c4_i32 = arith.constant 4 : i32
    %0 = arith.muli %arg1, %c4_i32 : i32
    %1 = tpu.assume_multiple %0, 4 : i32
    %cst = arith.constant 0.000000e+00 : bf16
    %2 = vector.broadcast %cst : bf16 to vector<32x112xbf16>
    %c0 = arith.constant 0 : index
    %c144 = arith.constant 144 : index
    %3 = vector.load %arg5[%c0, %c144] : memref<32x256xbf16, #tpu.memory_space<vmem>>, vector<32x112xbf16>
    tpu.vector_store %arg5[%c0, %c144], %2 {strides = array<i32>} : memref<32x256xbf16, #tpu.memory_space<vmem>>, vector<32x112xbf16>,
    %c0_i32 = arith.constant 0 : i32
    %4 = arith.addi %1, %c0_i32 : i32
    %c0_0 = arith.constant 0 : index
    %5 = arith.index_cast %4 : i32 to index
    %c0_1 = arith.constant 0 : index
    %c0_2 = arith.constant 0 : index
    %6 = vector.load %arg3[%c0_0, %5, %c0_1, %c0_2] : memref<1x10x10x16xbf16, #tpu.memory_space<vmem>>, vector<1x4x8x16xbf16>
    %7 = vector.shape_cast %6 : vector<1x4x8x16xbf16> to vector<4x8x16xbf16>
    %8 = vector.shape_cast %7 : vector<4x8x16xbf16> to vector<32x16xbf16>
    %c0_3 = arith.constant 0 : index
    %c0_4 = arith.constant 0 : index
    %9 = vector.load %arg5[%c0_3, %c0_4] : memref<32x256xbf16, #tpu.memory_space<vmem>>, vector<32x16xbf16>
    tpu.vector_store %arg5[%c0_3, %c0_4], %8 {strides = array<i32>} : memref<32x256xbf16, #tpu.memory_space<vmem>>, vector<32x16xbf16>,
    %c0_i32_5 = arith.constant 0 : i32
    %10 = arith.addi %1, %c0_i32_5 : i32
    %c0_6 = arith.constant 0 : index
    %11 = arith.index_cast %10 : i32 to index
    %c1 = arith.constant 1 : index
    %c0_7 = arith.constant 0 : index
    %12 = vector.load %arg3[%c0_6, %11, %c1, %c0_7] : memref<1x10x10x16xbf16, #tpu.memory_space<vmem>>, vector<1x4x8x16xbf16>
    %13 = vector.shape_cast %12 : vector<1x4x8x16xbf16> to vector<4x8x16xbf16>
    %14 = vector.shape_cast %13 : vector<4x8x16xbf16> to vector<32x16xbf16>
    %c0_8 = arith.constant 0 : index
    %c16 = arith.constant 16 : index
    %15 = vector.load %arg5[%c0_8, %c16] : memref<32x256xbf16, #tpu.memory_space<vmem>>, vector<32x16xbf16>
    tpu.vector_store %arg5[%c0_8, %c16], %14 {strides = array<i32>} : memref<32x256xbf16, #tpu.memory_space<vmem>>, vector<32x16xbf16>,
    %c0_i32_9 = arith.constant 0 : i32
    %16 = arith.addi %1, %c0_i32_9 : i32
    %c0_10 = arith.constant 0 : index
    %17 = arith.index_cast %16 : i32 to index
    %c2 = arith.constant 2 : index
    %c0_11 = arith.constant 0 : index
    %18 = vector.load %arg3[%c0_10, %17, %c2, %c0_11] : memref<1x10x10x16xbf16, #tpu.memory_space<vmem>>, vector<1x4x8x16xbf16>
    %19 = vector.shape_cast %18 : vector<1x4x8x16xbf16> to vector<4x8x16xbf16>
    %20 = vector.shape_cast %19 : vector<4x8x16xbf16> to vector<32x16xbf16>
    %c0_12 = arith.constant 0 : index
    %c32 = arith.constant 32 : index
    %21 = vector.load %arg5[%c0_12, %c32] : memref<32x256xbf16, #tpu.memory_space<vmem>>, vector<32x16xbf16>
    tpu.vector_store %arg5[%c0_12, %c32], %20 {strides = array<i32>} : memref<32x256xbf16, #tpu.memory_space<vmem>>, vector<32x16xbf16>,
    %c1_i32 = arith.constant 1 : i32
    %22 = arith.addi %1, %c1_i32 : i32
    %c0_13 = arith.constant 0 : index
    %23 = arith.index_cast %22 : i32 to index
    %c0_14 = arith.constant 0 : index
    %c0_15 = arith.constant 0 : index
    %24 = vector.load %arg3[%c0_13, %23, %c0_14, %c0_15] : memref<1x10x10x16xbf16, #tpu.memory_space<vmem>>, vector<1x4x8x16xbf16>
    %25 = vector.shape_cast %24 : vector<1x4x8x16xbf16> to vector<4x8x16xbf16>
    %26 = vector.shape_cast %25 : vector<4x8x16xbf16> to vector<32x16xbf16>
    %c0_16 = arith.constant 0 : index
    %c48 = arith.constant 48 : index
    %27 = vector.load %arg5[%c0_16, %c48] : memref<32x256xbf16, #tpu.memory_space<vmem>>, vector<32x16xbf16>
    tpu.vector_store %arg5[%c0_16, %c48], %26 {strides = array<i32>} : memref<32x256xbf16, #tpu.memory_space<vmem>>, vector<32x16xbf16>,
    %c1_i32_17 = arith.constant 1 : i32
    %28 = arith.addi %1, %c1_i32_17 : i32
    %c0_18 = arith.constant 0 : index
    %29 = arith.index_cast %28 : i32 to index
    %c1_19 = arith.constant 1 : index
    %c0_20 = arith.constant 0 : index
    %30 = vector.load %arg3[%c0_18, %29, %c1_19, %c0_20] : memref<1x10x10x16xbf16, #tpu.memory_space<vmem>>, vector<1x4x8x16xbf16>
    %31 = vector.shape_cast %30 : vector<1x4x8x16xbf16> to vector<4x8x16xbf16>
    %32 = vector.shape_cast %31 : vector<4x8x16xbf16> to vector<32x16xbf16>
    %c0_21 = arith.constant 0 : index
    %c64 = arith.constant 64 : index
    %33 = vector.load %arg5[%c0_21, %c64] : memref<32x256xbf16, #tpu.memory_space<vmem>>, vector<32x16xbf16>
    tpu.vector_store %arg5[%c0_21, %c64], %32 {strides = array<i32>} : memref<32x256xbf16, #tpu.memory_space<vmem>>, vector<32x16xbf16>,
    %c1_i32_22 = arith.constant 1 : i32
    %34 = arith.addi %1, %c1_i32_22 : i32
    %c0_23 = arith.constant 0 : index
    %35 = arith.index_cast %34 : i32 to index
    %c2_24 = arith.constant 2 : index
    %c0_25 = arith.constant 0 : index
    %36 = vector.load %arg3[%c0_23, %35, %c2_24, %c0_25] : memref<1x10x10x16xbf16, #tpu.memory_space<vmem>>, vector<1x4x8x16xbf16>
    %37 = vector.shape_cast %36 : vector<1x4x8x16xbf16> to vector<4x8x16xbf16>
    %38 = vector.shape_cast %37 : vector<4x8x16xbf16> to vector<32x16xbf16>
    %c0_26 = arith.constant 0 : index
    %c80 = arith.constant 80 : index
    %39 = vector.load %arg5[%c0_26, %c80] : memref<32x256xbf16, #tpu.memory_space<vmem>>, vector<32x16xbf16>
    tpu.vector_store %arg5[%c0_26, %c80], %38 {strides = array<i32>} : memref<32x256xbf16, #tpu.memory_space<vmem>>, vector<32x16xbf16>,
    %c2_i32 = arith.constant 2 : i32
    %40 = arith.addi %1, %c2_i32 : i32
    %c0_27 = arith.constant 0 : index
    %41 = arith.index_cast %40 : i32 to index
    %c0_28 = arith.constant 0 : index
    %c0_29 = arith.constant 0 : index
    %42 = vector.load %arg3[%c0_27, %41, %c0_28, %c0_29] : memref<1x10x10x16xbf16, #tpu.memory_space<vmem>>, vector<1x4x8x16xbf16>
    %43 = vector.shape_cast %42 : vector<1x4x8x16xbf16> to vector<4x8x16xbf16>
    %44 = vector.shape_cast %43 : vector<4x8x16xbf16> to vector<32x16xbf16>
    %c0_30 = arith.constant 0 : index
    %c96 = arith.constant 96 : index
    %45 = vector.load %arg5[%c0_30, %c96] : memref<32x256xbf16, #tpu.memory_space<vmem>>, vector<32x16xbf16>
    tpu.vector_store %arg5[%c0_30, %c96], %44 {strides = array<i32>} : memref<32x256xbf16, #tpu.memory_space<vmem>>, vector<32x16xbf16>,
    %c2_i32_31 = arith.constant 2 : i32
    %46 = arith.addi %1, %c2_i32_31 : i32
    %c0_32 = arith.constant 0 : index
    %47 = arith.index_cast %46 : i32 to index
    %c1_33 = arith.constant 1 : index
    %c0_34 = arith.constant 0 : index
    %48 = vector.load %arg3[%c0_32, %47, %c1_33, %c0_34] : memref<1x10x10x16xbf16, #tpu.memory_space<vmem>>, vector<1x4x8x16xbf16>
    %49 = vector.shape_cast %48 : vector<1x4x8x16xbf16> to vector<4x8x16xbf16>
    %50 = vector.shape_cast %49 : vector<4x8x16xbf16> to vector<32x16xbf16>
    %c0_35 = arith.constant 0 : index
    %c112 = arith.constant 112 : index
    %51 = vector.load %arg5[%c0_35, %c112] : memref<32x256xbf16, #tpu.memory_space<vmem>>, vector<32x16xbf16>
    tpu.vector_store %arg5[%c0_35, %c112], %50 {strides = array<i32>} : memref<32x256xbf16, #tpu.memory_space<vmem>>, vector<32x16xbf16>,
    %c2_i32_36 = arith.constant 2 : i32
    %52 = arith.addi %1, %c2_i32_36 : i32
    %c0_37 = arith.constant 0 : index
    %53 = arith.index_cast %52 : i32 to index
    %c2_38 = arith.constant 2 : index
    %c0_39 = arith.constant 0 : index
    %54 = vector.load %arg3[%c0_37, %53, %c2_38, %c0_39] : memref<1x10x10x16xbf16, #tpu.memory_space<vmem>>, vector<1x4x8x16xbf16>
    %55 = vector.shape_cast %54 : vector<1x4x8x16xbf16> to vector<4x8x16xbf16>
    %56 = vector.shape_cast %55 : vector<4x8x16xbf16> to vector<32x16xbf16>
    %c0_40 = arith.constant 0 : index
    %c128 = arith.constant 128 : index
    %57 = vector.load %arg5[%c0_40, %c128] : memref<32x256xbf16, #tpu.memory_space<vmem>>, vector<32x16xbf16>
    tpu.vector_store %arg5[%c0_40, %c128], %56 {strides = array<i32>} : memref<32x256xbf16, #tpu.memory_space<vmem>>, vector<32x16xbf16>,
    %c0_41 = arith.constant 0 : index
    %c0_42 = arith.constant 0 : index
    %58 = vector.load %arg5[%c0_41, %c0_42] : memref<32x256xbf16, #tpu.memory_space<vmem>>, vector<32x256xbf16>
    %c0_43 = arith.constant 0 : index
    %c0_44 = arith.constant 0 : index
    %59 = vector.load %arg2[%c0_43, %c0_44] : memref<256x128xbf16, #tpu.memory_space<vmem>>, vector<256x128xbf16>
    %cst_45 = arith.constant dense<0.000000e+00> : vector<32x128xf32>
    %60 = tpu.matmul %58, %59, %cst_45 {dimension_numbers = #tpu.dot_dimension_numbers<[1], [0], [0], [1], [0, 0, 1, 1], [], []>} : vector<32x256xbf16>, vector<256x128xbf16>, vector<32x128xf32> -> vector<32x128xf32>
    %cst_46 = arith.constant dense<0.000000e+00> : vector<128xf32>
    %61 = vector.multi_reduction <add>, %60, %cst_46 [0] : vector<32x128xf32> to vector<128xf32>
    %62 = vector.shape_cast %61 : vector<128xf32> to vector<1x128xf32>
    %cst_47 = arith.constant 3.125000e-02 : f32
    %63 = vector.broadcast %cst_47 : f32 to vector<1x128xf32>
    %64 = arith.mulf %62, %63 : vector<1x128xf32>
    %65 = vector.broadcast %64 : vector<1x128xf32> to vector<32x128xf32>
    %66 = arith.subf %60, %65 : vector<32x128xf32>
    %67 = arith.mulf %66, %66 : vector<32x128xf32>
    %cst_48 = arith.constant dense<0.000000e+00> : vector<128xf32>
    %68 = vector.multi_reduction <add>, %67, %cst_48 [0] : vector<32x128xf32> to vector<128xf32>
    %69 = vector.shape_cast %68 : vector<128xf32> to vector<1x128xf32>
    %c0_49 = arith.constant 0 : index
    %c0_50 = arith.constant 0 : index
    %c0_51 = arith.constant 0 : index
    %70 = vector.load %arg4[%c0_49, %c0_50, %c0_51] : memref<1x2x128xf32, #tpu.memory_space<vmem>>, vector<1x1x128xf32>
    %71 = vector.shape_cast %70 : vector<1x1x128xf32> to vector<1x128xf32>
    %72 = vector.shape_cast %62 : vector<1x128xf32> to vector<1x1x128xf32>
    tpu.vector_store %arg4[%c0_49, %c0_50, %c0_51], %72 {strides = array<i32>} : memref<1x2x128xf32, #tpu.memory_space<vmem>>, vector<1x1x128xf32>,
    %c0_52 = arith.constant 0 : index
    %c1_53 = arith.constant 1 : index
    %c0_54 = arith.constant 0 : index
    %73 = vector.load %arg4[%c0_52, %c1_53, %c0_54] : memref<1x2x128xf32, #tpu.memory_space<vmem>>, vector<1x1x128xf32>
    %74 = vector.shape_cast %73 : vector<1x1x128xf32> to vector<1x128xf32>
    %75 = vector.shape_cast %69 : vector<1x128xf32> to vector<1x1x128xf32>
    tpu.vector_store %arg4[%c0_52, %c1_53, %c0_54], %75 {strides = array<i32>} : memref<1x2x128xf32, #tpu.memory_space<vmem>>, vector<1x1x128xf32>,
    return
  }
  func.func @transform_0(%arg0: i32, %arg1: i32) -> (i32, i32) {
    %c0_i32 = arith.constant 0 : i32
    %c0_i32_0 = arith.constant 0 : i32
    %c0_i32_1 = arith.constant 0 : i32
    return %c0_i32, %c0_i32_0 : i32, i32
  }
  func.func @transform_1(%arg0: i32, %arg1: i32) -> (i32, i32, i32, i32) {
    %c0_i32 = arith.constant 0 : i32
    %c0_i32_0 = arith.constant 0 : i32
    %c0_i32_1 = arith.constant 0 : i32
    %c0_i32_2 = arith.constant 0 : i32
    return %arg0, %c0_i32, %c0_i32_0, %c0_i32_1 : i32, i32, i32, i32
  }
  func.func @transform_2(%arg0: i32, %arg1: i32) -> (i32, i32, i32) {
    %c2_i32 = arith.constant 2 : i32
    %0 = arith.muli %arg0, %c2_i32 : i32
    %1 = arith.addi %0, %arg1 : i32
    %c0_i32 = arith.constant 0 : i32
    %c0_i32_0 = arith.constant 0 : i32
    %c0_i32_1 = arith.constant 0 : i32
    return %1, %c0_i32, %c0_i32_0 : i32, i32, i32
  }
}

module attributes {stable_mosaic.version = 11 : i64} {
  func.func @conv_bn_relu_kernel(%arg0: i32, %arg1: i32, %arg2: memref<256x128xbf16, #tpu.memory_space<vmem>>, %arg3: memref<1x10x10x16xbf16, #tpu.memory_space<vmem>>, %arg4: memref<1x128xf32, #tpu.memory_space<vmem>>, %arg5: memref<1x128xf32, #tpu.memory_space<vmem>>, %arg6: memref<1x4x8x8xf32, #tpu.memory_space<vmem>>, %arg7: memref<32x256xbf16, #tpu.memory_space<vmem>>) attributes {dimension_semantics = [#tpu.dimension_semantics<parallel>, #tpu.dimension_semantics<arbitrary>], iteration_bounds = array<i64: 2, 2>, scalar_prefetch = 0 : i64, scratch_operands = 1 : i64, tpu.core_type = #tpu.core_type<tc>, window_params = [{pipeline_mode = #tpu.pipeline_mode<synchronous>, transform_indices = @transform_0, window_bounds = array<i64: 256, 128>}, {transform_indices = @transform_1, window_bounds = array<i64: 1, 10, 10, 16>}, {pipeline_mode = #tpu.pipeline_mode<synchronous>, transform_indices = @transform_2, window_bounds = array<i64: 1, 128>}, {pipeline_mode = #tpu.pipeline_mode<synchronous>, transform_indices = @transform_3, window_bounds = array<i64: 1, 128>}, {transform_indices = @transform_4, window_bounds = array<i64: 1, 4, 8, 8>}]} {
    %c4_i32 = arith.constant 4 : i32
    %0 = arith.muli %arg1, %c4_i32 : i32
    %1 = tpu.assume_multiple %0, 4 : i32
    %cst = arith.constant 0.000000e+00 : bf16
    %2 = vector.broadcast %cst : bf16 to vector<32x112xbf16>
    %c0 = arith.constant 0 : index
    %c144 = arith.constant 144 : index
    %3 = vector.load %arg7[%c0, %c144] : memref<32x256xbf16, #tpu.memory_space<vmem>>, vector<32x112xbf16>
    tpu.vector_store %arg7[%c0, %c144], %2 {strides = array<i32>} : memref<32x256xbf16, #tpu.memory_space<vmem>>, vector<32x112xbf16>,
    %c0_i32 = arith.constant 0 : i32
    %4 = arith.addi %1, %c0_i32 : i32
    %c0_0 = arith.constant 0 : index
    %5 = arith.index_cast %4 : i32 to index
    %c0_1 = arith.constant 0 : index
    %c0_2 = arith.constant 0 : index
    %6 = vector.load %arg3[%c0_0, %5, %c0_1, %c0_2] : memref<1x10x10x16xbf16, #tpu.memory_space<vmem>>, vector<1x4x8x16xbf16>
    %7 = vector.shape_cast %6 : vector<1x4x8x16xbf16> to vector<4x8x16xbf16>
    %8 = vector.shape_cast %7 : vector<4x8x16xbf16> to vector<32x16xbf16>
    %c0_3 = arith.constant 0 : index
    %c0_4 = arith.constant 0 : index
    %9 = vector.load %arg7[%c0_3, %c0_4] : memref<32x256xbf16, #tpu.memory_space<vmem>>, vector<32x16xbf16>
    tpu.vector_store %arg7[%c0_3, %c0_4], %8 {strides = array<i32>} : memref<32x256xbf16, #tpu.memory_space<vmem>>, vector<32x16xbf16>,
    %c0_i32_5 = arith.constant 0 : i32
    %10 = arith.addi %1, %c0_i32_5 : i32
    %c0_6 = arith.constant 0 : index
    %11 = arith.index_cast %10 : i32 to index
    %c1 = arith.constant 1 : index
    %c0_7 = arith.constant 0 : index
    %12 = vector.load %arg3[%c0_6, %11, %c1, %c0_7] : memref<1x10x10x16xbf16, #tpu.memory_space<vmem>>, vector<1x4x8x16xbf16>
    %13 = vector.shape_cast %12 : vector<1x4x8x16xbf16> to vector<4x8x16xbf16>
    %14 = vector.shape_cast %13 : vector<4x8x16xbf16> to vector<32x16xbf16>
    %c0_8 = arith.constant 0 : index
    %c16 = arith.constant 16 : index
    %15 = vector.load %arg7[%c0_8, %c16] : memref<32x256xbf16, #tpu.memory_space<vmem>>, vector<32x16xbf16>
    tpu.vector_store %arg7[%c0_8, %c16], %14 {strides = array<i32>} : memref<32x256xbf16, #tpu.memory_space<vmem>>, vector<32x16xbf16>,
    %c0_i32_9 = arith.constant 0 : i32
    %16 = arith.addi %1, %c0_i32_9 : i32
    %c0_10 = arith.constant 0 : index
    %17 = arith.index_cast %16 : i32 to index
    %c2 = arith.constant 2 : index
    %c0_11 = arith.constant 0 : index
    %18 = vector.load %arg3[%c0_10, %17, %c2, %c0_11] : memref<1x10x10x16xbf16, #tpu.memory_space<vmem>>, vector<1x4x8x16xbf16>
    %19 = vector.shape_cast %18 : vector<1x4x8x16xbf16> to vector<4x8x16xbf16>
    %20 = vector.shape_cast %19 : vector<4x8x16xbf16> to vector<32x16xbf16>
    %c0_12 = arith.constant 0 : index
    %c32 = arith.constant 32 : index
    %21 = vector.load %arg7[%c0_12, %c32] : memref<32x256xbf16, #tpu.memory_space<vmem>>, vector<32x16xbf16>
    tpu.vector_store %arg7[%c0_12, %c32], %20 {strides = array<i32>} : memref<32x256xbf16, #tpu.memory_space<vmem>>, vector<32x16xbf16>,
    %c1_i32 = arith.constant 1 : i32
    %22 = arith.addi %1, %c1_i32 : i32
    %c0_13 = arith.constant 0 : index
    %23 = arith.index_cast %22 : i32 to index
    %c0_14 = arith.constant 0 : index
    %c0_15 = arith.constant 0 : index
    %24 = vector.load %arg3[%c0_13, %23, %c0_14, %c0_15] : memref<1x10x10x16xbf16, #tpu.memory_space<vmem>>, vector<1x4x8x16xbf16>
    %25 = vector.shape_cast %24 : vector<1x4x8x16xbf16> to vector<4x8x16xbf16>
    %26 = vector.shape_cast %25 : vector<4x8x16xbf16> to vector<32x16xbf16>
    %c0_16 = arith.constant 0 : index
    %c48 = arith.constant 48 : index
    %27 = vector.load %arg7[%c0_16, %c48] : memref<32x256xbf16, #tpu.memory_space<vmem>>, vector<32x16xbf16>
    tpu.vector_store %arg7[%c0_16, %c48], %26 {strides = array<i32>} : memref<32x256xbf16, #tpu.memory_space<vmem>>, vector<32x16xbf16>,
    %c1_i32_17 = arith.constant 1 : i32
    %28 = arith.addi %1, %c1_i32_17 : i32
    %c0_18 = arith.constant 0 : index
    %29 = arith.index_cast %28 : i32 to index
    %c1_19 = arith.constant 1 : index
    %c0_20 = arith.constant 0 : index
    %30 = vector.load %arg3[%c0_18, %29, %c1_19, %c0_20] : memref<1x10x10x16xbf16, #tpu.memory_space<vmem>>, vector<1x4x8x16xbf16>
    %31 = vector.shape_cast %30 : vector<1x4x8x16xbf16> to vector<4x8x16xbf16>
    %32 = vector.shape_cast %31 : vector<4x8x16xbf16> to vector<32x16xbf16>
    %c0_21 = arith.constant 0 : index
    %c64 = arith.constant 64 : index
    %33 = vector.load %arg7[%c0_21, %c64] : memref<32x256xbf16, #tpu.memory_space<vmem>>, vector<32x16xbf16>
    tpu.vector_store %arg7[%c0_21, %c64], %32 {strides = array<i32>} : memref<32x256xbf16, #tpu.memory_space<vmem>>, vector<32x16xbf16>,
    %c1_i32_22 = arith.constant 1 : i32
    %34 = arith.addi %1, %c1_i32_22 : i32
    %c0_23 = arith.constant 0 : index
    %35 = arith.index_cast %34 : i32 to index
    %c2_24 = arith.constant 2 : index
    %c0_25 = arith.constant 0 : index
    %36 = vector.load %arg3[%c0_23, %35, %c2_24, %c0_25] : memref<1x10x10x16xbf16, #tpu.memory_space<vmem>>, vector<1x4x8x16xbf16>
    %37 = vector.shape_cast %36 : vector<1x4x8x16xbf16> to vector<4x8x16xbf16>
    %38 = vector.shape_cast %37 : vector<4x8x16xbf16> to vector<32x16xbf16>
    %c0_26 = arith.constant 0 : index
    %c80 = arith.constant 80 : index
    %39 = vector.load %arg7[%c0_26, %c80] : memref<32x256xbf16, #tpu.memory_space<vmem>>, vector<32x16xbf16>
    tpu.vector_store %arg7[%c0_26, %c80], %38 {strides = array<i32>} : memref<32x256xbf16, #tpu.memory_space<vmem>>, vector<32x16xbf16>,
    %c2_i32 = arith.constant 2 : i32
    %40 = arith.addi %1, %c2_i32 : i32
    %c0_27 = arith.constant 0 : index
    %41 = arith.index_cast %40 : i32 to index
    %c0_28 = arith.constant 0 : index
    %c0_29 = arith.constant 0 : index
    %42 = vector.load %arg3[%c0_27, %41, %c0_28, %c0_29] : memref<1x10x10x16xbf16, #tpu.memory_space<vmem>>, vector<1x4x8x16xbf16>
    %43 = vector.shape_cast %42 : vector<1x4x8x16xbf16> to vector<4x8x16xbf16>
    %44 = vector.shape_cast %43 : vector<4x8x16xbf16> to vector<32x16xbf16>
    %c0_30 = arith.constant 0 : index
    %c96 = arith.constant 96 : index
    %45 = vector.load %arg7[%c0_30, %c96] : memref<32x256xbf16, #tpu.memory_space<vmem>>, vector<32x16xbf16>
    tpu.vector_store %arg7[%c0_30, %c96], %44 {strides = array<i32>} : memref<32x256xbf16, #tpu.memory_space<vmem>>, vector<32x16xbf16>,
    %c2_i32_31 = arith.constant 2 : i32
    %46 = arith.addi %1, %c2_i32_31 : i32
    %c0_32 = arith.constant 0 : index
    %47 = arith.index_cast %46 : i32 to index
    %c1_33 = arith.constant 1 : index
    %c0_34 = arith.constant 0 : index
    %48 = vector.load %arg3[%c0_32, %47, %c1_33, %c0_34] : memref<1x10x10x16xbf16, #tpu.memory_space<vmem>>, vector<1x4x8x16xbf16>
    %49 = vector.shape_cast %48 : vector<1x4x8x16xbf16> to vector<4x8x16xbf16>
    %50 = vector.shape_cast %49 : vector<4x8x16xbf16> to vector<32x16xbf16>
    %c0_35 = arith.constant 0 : index
    %c112 = arith.constant 112 : index
    %51 = vector.load %arg7[%c0_35, %c112] : memref<32x256xbf16, #tpu.memory_space<vmem>>, vector<32x16xbf16>
    tpu.vector_store %arg7[%c0_35, %c112], %50 {strides = array<i32>} : memref<32x256xbf16, #tpu.memory_space<vmem>>, vector<32x16xbf16>,
    %c2_i32_36 = arith.constant 2 : i32
    %52 = arith.addi %1, %c2_i32_36 : i32
    %c0_37 = arith.constant 0 : index
    %53 = arith.index_cast %52 : i32 to index
    %c2_38 = arith.constant 2 : index
    %c0_39 = arith.constant 0 : index
    %54 = vector.load %arg3[%c0_37, %53, %c2_38, %c0_39] : memref<1x10x10x16xbf16, #tpu.memory_space<vmem>>, vector<1x4x8x16xbf16>
    %55 = vector.shape_cast %54 : vector<1x4x8x16xbf16> to vector<4x8x16xbf16>
    %56 = vector.shape_cast %55 : vector<4x8x16xbf16> to vector<32x16xbf16>
    %c0_40 = arith.constant 0 : index
    %c128 = arith.constant 128 : index
    %57 = vector.load %arg7[%c0_40, %c128] : memref<32x256xbf16, #tpu.memory_space<vmem>>, vector<32x16xbf16>
    tpu.vector_store %arg7[%c0_40, %c128], %56 {strides = array<i32>} : memref<32x256xbf16, #tpu.memory_space<vmem>>, vector<32x16xbf16>,
    %c0_41 = arith.constant 0 : index
    %c0_42 = arith.constant 0 : index
    %58 = vector.load %arg7[%c0_41, %c0_42] : memref<32x256xbf16, #tpu.memory_space<vmem>>, vector<32x256xbf16>
    %c0_43 = arith.constant 0 : index
    %c0_44 = arith.constant 0 : index
    %59 = vector.load %arg2[%c0_43, %c0_44] : memref<256x128xbf16, #tpu.memory_space<vmem>>, vector<256x128xbf16>
    %cst_45 = arith.constant dense<0.000000e+00> : vector<32x128xf32>
    %60 = tpu.matmul %58, %59, %cst_45 {dimension_numbers = #tpu.dot_dimension_numbers<[1], [0], [0], [1], [0, 0, 1, 1], [], []>} : vector<32x256xbf16>, vector<256x128xbf16>, vector<32x128xf32> -> vector<32x128xf32>
    %c0_46 = arith.constant 0 : index
    %c0_47 = arith.constant 0 : index
    %61 = vector.load %arg4[%c0_46, %c0_47] : memref<1x128xf32, #tpu.memory_space<vmem>>, vector<1x128xf32>
    %62 = vector.broadcast %61 : vector<1x128xf32> to vector<32x128xf32>
    %63 = arith.mulf %60, %62 : vector<32x128xf32>
    %c0_48 = arith.constant 0 : index
    %c0_49 = arith.constant 0 : index
    %64 = vector.load %arg5[%c0_48, %c0_49] : memref<1x128xf32, #tpu.memory_space<vmem>>, vector<1x128xf32>
    %65 = vector.broadcast %64 : vector<1x128xf32> to vector<32x128xf32>
    %66 = arith.addf %63, %65 : vector<32x128xf32>
    %cst_50 = arith.constant 0.000000e+00 : f32
    %67 = vector.broadcast %cst_50 : f32 to vector<32x128xf32>
    %68 = arith.maximumf %66, %67 : vector<32x128xf32>
    %69 = vector.extract_strided_slice %68 {offsets = [0, 0], sizes = [32, 8], strides = [1, 1]} : vector<32x128xf32> to vector<32x8xf32>
    %70 = vector.shape_cast %69 : vector<32x8xf32> to vector<4x8x8xf32>
    %c0_51 = arith.constant 0 : index
    %c0_52 = arith.constant 0 : index
    %c0_53 = arith.constant 0 : index
    %c0_54 = arith.constant 0 : index
    %71 = vector.load %arg6[%c0_51, %c0_52, %c0_53, %c0_54] : memref<1x4x8x8xf32, #tpu.memory_space<vmem>>, vector<1x4x8x8xf32>
    %72 = vector.shape_cast %71 : vector<1x4x8x8xf32> to vector<4x8x8xf32>
    %73 = vector.shape_cast %70 : vector<4x8x8xf32> to vector<1x4x8x8xf32>
    tpu.vector_store %arg6[%c0_51, %c0_52, %c0_53, %c0_54], %73 {strides = array<i32>} : memref<1x4x8x8xf32, #tpu.memory_space<vmem>>, vector<1x4x8x8xf32>,
    return
  }
  func.func @transform_0(%arg0: i32, %arg1: i32) -> (i32, i32) {
    %c0_i32 = arith.constant 0 : i32
    %c0_i32_0 = arith.constant 0 : i32
    %c0_i32_1 = arith.constant 0 : i32
    return %c0_i32, %c0_i32_0 : i32, i32
  }
  func.func @transform_1(%arg0: i32, %arg1: i32) -> (i32, i32, i32, i32) {
    %c0_i32 = arith.constant 0 : i32
    %c0_i32_0 = arith.constant 0 : i32
    %c0_i32_1 = arith.constant 0 : i32
    %c0_i32_2 = arith.constant 0 : i32
    return %arg0, %c0_i32, %c0_i32_0, %c0_i32_1 : i32, i32, i32, i32
  }
  func.func @transform_2(%arg0: i32, %arg1: i32) -> (i32, i32) {
    %c0_i32 = arith.constant 0 : i32
    %c0_i32_0 = arith.constant 0 : i32
    %c0_i32_1 = arith.constant 0 : i32
    return %c0_i32, %c0_i32_0 : i32, i32
  }
  func.func @transform_3(%arg0: i32, %arg1: i32) -> (i32, i32) {
    %c0_i32 = arith.constant 0 : i32
    %c0_i32_0 = arith.constant 0 : i32
    %c0_i32_1 = arith.constant 0 : i32
    return %c0_i32, %c0_i32_0 : i32, i32
  }
  func.func @transform_4(%arg0: i32, %arg1: i32) -> (i32, i32, i32, i32) {
    %c0_i32 = arith.constant 0 : i32
    %c0_i32_0 = arith.constant 0 : i32
    %c0_i32_1 = arith.constant 0 : i32
    return %arg0, %arg1, %c0_i32, %c0_i32_0 : i32, i32, i32, i32
  }
}

</mosaic_0001>

<bundles_post_ra>
// kernel: encoder_block_forward.2
= control target key start
LH: loop header
LB: loop body
LE: loop exit
PB: predicated region body
PF: predicated region fallthrough
CT: control target
= control target key end

     0   :  { %s1212_s9 = smov 0   ;;  %s1214_s10 = smov 0   ;;  %s1530_s0 = inlined_call_operand.vmem [shape: bf16[256,128], index: 0, kind: input, shape index: {}]   ;;  %s1531_s1 = inlined_call_operand.vmem [shape: bf16[2,10,10,16], index: 1, kind: input, shape index: {}]   ;;  %s1532_s2 = inlined_call_operand.vmem [shape: f32[4,2,128], index: 2, kind: output, shape index: {}]  }
   0x1   :  { %s1216_s11 = smov 0   ;;  %s1218_s12 = smov 0  }
   0x2   :  { %s1220_s13 = smov 0  }
   0x3 LB: > { %s21_s14 = sadd.s32 1, %s1179_s11  ;;  %s24_s15 = sadd.s32 1, %s1183_s12  ;;  %s1187_s13 = sphi %s1220_s13, %s12_s13   ;;  %s1183_s12 = sphi %s1218_s12, %s1540_s12   ;;  %s1179_s11 = sphi %s1216_s11, %s1539_s11   ;;  %s1175_s10 = sphi %s1214_s10, %s1538_s10   ;;  %s1171_s9 = sphi %s1212_s9, %s1537_s9  }
   0x4   : > { %p22_p0 = scmp.ge.s32.totalorder %s21_s14, 2  ;;  %p945_p1 = scmp.ge.s32.totalorder %s1187_s13, 1 }
   0x5   : > { %p128_p2 = scmp.lt.s32.totalorder %s1187_s13, 5 }
   0x6   : > { %s1542_s14 = smov (%p22_p0, %s21_s14), 0  ;;  %s1544_s15 = smov (!%p22_p0, %s24_s15), %s1183_s12 }
   0x7   : > { %p129_p3 = pnand %p945_p1, %p128_p2  ;;  %p26_p4 = scmp.ge.s32.totalorder %s1544_s15, 2 }
   0x8   : > { %p151_p5 = scmp.lt.s32.totalorder (!%p129_p3), %s1175_s10, 1  ;;  %s1031_s17 = sshll.u32 (!%p129_p3), %s1171_s9, 5 }
   0x9   : > { %s1546_s15 = smov (%p26_p4, %s1544_s15), 0  ;;  %132 = sbr.rel (%p129_p3) target bundleno = 442 (0x1ba), region = 28 }
   0xa   : > { %s1189_s23 = smov (!%p129_p3), 48   ;;  %s1190_s24 = smov (!%p129_p3), 32  }
   0xb   : > { %s1191_s3 = smov (!%p129_p3), 16   ;;  %s1192_s6 = smov (!%p129_p3), 64  }
   0xc   : > { %s1193_s20 = smov (!%p129_p3), 80   ;;  %s1194_s30 = smov (!%p129_p3), 96  }
   0xd   : > { %s1195_s7 = smov (!%p129_p3), 112  }
   0xe   : > { %s152_s16 = scalar_select %p151_p5, %s1175_s10, 1  ;;  %vm283_vm0 = vcmask 1042432   ;;  %vm191_vm1 = vsmask.f32 3328  ;;  %vm284_vm2 = vcmask 1046532   ;;  %v1127_v28 = vld [vmem:[%s1530_s0 + $0x78] sm:$0xff]  }
   0xf   : > { %vm192_vm3 = vsmask.f32 7440  ;;  %vm1260_vm4 = vmor %vm283_vm0, %vm284_vm2  ;;  %v1128_v35 = vld [vmem:[%s1530_s0 + $0x38] sm:$0xff]   ;;  %1034 = vmatprep.subr.bf16.mxu0 %v1127_v28  ;;  %1062 = vmatprep.subr.bf16.mxu1 %v1127_v28  ;;  %v1129_v51 = vld [vmem:[%s1530_s0 + $0x70] sm:$0xff]   ;;  %vm178_vm6 = vcmask 125952   ;;  %vm166_vm7 = vcmask 1043584  }
  0x10   : > { %s1078_s18 = smul.u32 80, %s152_s16  ;;  %vm1280_vm5 = vmor %vm191_vm1, %vm192_vm3  ;;  %1035 = vmatpush3.bf16.msra.mxu0 %v1128_v35  ;;  %1070 = vmatpush3.bf16.msra.mxu1 %v1128_v35  ;;  %v1130_v62 = vld [vmem:[%s1530_s0 + $0x30] sm:$0xff]   ;;  %vm262_vm8 = vcmask 257152   ;;  %vm314_vm9 = vcmask 388352   ;;  %vm343_vm10 = vcmask 519552   ;;  %vm424_vm11 = vcmask 650752  }
  0x11   : > { %1036 = vmatprep.subr.bf16.mxu0 %v1129_v51  ;;  %1063 = vmatprep.subr.bf16.mxu1 %v1129_v51  ;;  %vm473_vm12 = vcmask 781952   ;;  %vm502_vm13 = vcmask 913152   ;;  %vm583_vm14 = vcmask 1044352  }
  0x12   : > { %s155_s21 = scalar_lea.vmem %s1531_s1, %s1078_s18 }
  0x13   : > { %s1252_s22 = scalar_lea.vmem %s155_s21, %s1031_s17 }
  0x14   : > { %v959_v0 = vld [vmem:[%s1252_s22 + $0x10] sm:$0xf]  ;;  %v958_v1 = vld [vmem:[%s1252_s22 + $0x8] sm:$0xf]  ;;  %v267_v2 = vld [vmem:[%s1252_s22] sm:$0xe]  ;;  %1037 = vmatpush3.bf16.msra.mxu0 %v1130_v62  ;;  %1071 = vmatpush3.bf16.msra.mxu1 %v1130_v62 }
  0x15   : > { %333 = vrot.lane.b32.xlu1 %v959_v0, %s1189_s23  ;;  %331 = vrot.lane.b32.xlu0 %v958_v1, %s1189_s23  ;;  %v268_v3 = vld [vmem:[%s1252_s22 + $0x4] sm:$0x1]  ;;  %v952_v5 = vrot.slane %v267_v2, 9  ;;  %v183_v6 = vld [vmem:[%s1252_s22] sm:$0xf] }
  0x16   : > { %v288_v7 = vrot.slane %v268_v3, 5  ;;  %v184_v8 = vld [vmem:[%s1252_s22 + $0x4] sm:$0x1]  ;;  %v195_v9 = vshrl.u32 %v183_v6, 16  ;;  %v198_v10 = vshll.u32 %v183_v6, 16 }
  0x17   : > { %v204_v11 = vshll.u32 %v184_v8, 16  ;;  %v269_v12 = vld [vmem:[%s1252_s22 + $0x8] sm:$0xe]  ;;  %v270_v13 = vld [vmem:[%s1252_s22 + $0xc] sm:$0x1] }
  0x18   : > { %v289_v14 = vsel %vm1260_vm4, %v952_v5, %v288_v7  ;;  %v197_v15 = vrot.slane %v195_v9, 4  ;;  %v200_v16 = vrot.slane %v198_v10, 5  ;;  %v953_v17 = vrot.slane %v269_v12, 9  ;;  %v185_v18 = vld [vmem:[%s1252_s22 + $0x8] sm:$0xf] }
  0x19   : > { %302 = vrot.lane.b32.xlu1 %v289_v14, %s1190_s24  ;;  %v206_v19 = vrot.slane %v204_v11, 5  ;;  %v292_v20 = vrot.slane %v270_v13, 5  ;;  %v186_v21 = vld [vmem:[%s1252_s22 + $0xc] sm:$0x1]  ;;  %v209_v22 = vshrl.u32 %v185_v18, 16  ;;  %v212_v23 = vshll.u32 %v185_v18, 16 }
  0x1a   : > { %v201_v24 = vor.u32 %v200_v16, %v197_v15  ;;  %v218_v25 = vshll.u32 %v186_v21, 16  ;;  %v964_v26 = vld [vmem:[%s1252_s22 + $0x10] sm:$0xf]  ;;  %v965_v27 = vld [vmem:[%s1252_s22 + $0x14] sm:$0x1] }
  0x1b   : > { %v293_v30 = vsel %vm1260_vm4, %v953_v17, %v292_v20  ;;  %v211_v31 = vrot.slane %v209_v22, 4  ;;  %v214_v32 = vrot.slane %v212_v23, 5  ;;  %v371_v33 = vshrl.u32 %v964_v26, 16  ;;  %v962_v34 = vld [vmem:[%s1252_s22 + $0x8] sm:$0xf] }
  0x1c   : > { %v202_v36 = vrot.slane %v201_v24, 4  ;;  %v220_v37 = vrot.slane %v218_v25, 5  ;;  %v374_v38 = vshll.u32 %v964_v26, 16  ;;  %v380_v39 = vshll.u32 %v965_v27, 16  ;;  %v963_v40 = vld [vmem:[%s1252_s22 + $0xc] sm:$0x1] }
  0x1d   : > { %304 = vrot.lane.b32.xlu1 %v293_v30, %s1190_s24  ;;  %v215_v41 = vor.u32 %v214_v32, %v211_v31  ;;  %v373_v42 = vrot.slane %v371_v33, 4  ;;  %v357_v43 = vshrl.u32 %v962_v34, 16  ;;  %v360_v44 = vshll.u32 %v962_v34, 16  ;;  %v189_v45 = vld [vmem:[%s1252_s22 + $0x18] sm:$0xf]  ;;  %v1131_v23 = vld [vmem:[%s1530_s0 + $0x68] sm:$0xff]  }
  0x1e   : > { %v207_v46 = vsel %vm1280_vm5, %v202_v36, %v206_v19  ;;  %v376_v47 = vrot.slane %v374_v38, 5  ;;  %v382_v48 = vrot.slane %v380_v39, 5  ;;  %v366_v49 = vshll.u32 %v963_v40, 16  ;;  %v190_v50 = vld [vmem:[%s1252_s22 + $0x1c] sm:$0x1]  ;;  %1038 = vmatprep.subr.bf16.mxu0 %v1131_v23  ;;  %v1132_v32 = vld [vmem:[%s1530_s0 + $0x28] sm:$0xff]   ;;  %1064 = vmatprep.subr.bf16.mxu1 %v1131_v23 }
  0x1f   : > { %250 = vrot.lane.b32.xlu0 %v207_v46, %s1191_s3  ;;  %v216_v52 = vrot.slane %v215_v41, 4  ;;  %v359_v53 = vrot.slane %v357_v43, 4  ;;  %v362_v54 = vrot.slane %v360_v44, 5  ;;  %v237_v55 = vshrl.u32 %v189_v45, 16  ;;  %v187_v56 = vld [vmem:[%s1252_s22 + $0x10] sm:$0xf]  ;;  %1039 = vmatpush3.bf16.msra.mxu0 %v1132_v32 }
  0x20   : > { %v377_v57 = vor.u32 %v376_v47, %v373_v42  ;;  %v368_v58 = vrot.slane %v366_v49, 5  ;;  %v240_v59 = vshll.u32 %v189_v45, 16  ;;  %v246_v60 = vshll.u32 %v190_v50, 16  ;;  %v188_v61 = vld [vmem:[%s1252_s22 + $0x14] sm:$0x1]  ;;  %v1133_v46 = vld [vmem:[%s1530_s0 + $0x60] sm:$0xff]   ;;  %1072 = vmatpush3.bf16.msra.mxu1 %v1132_v32 }
  0x21   : > { %v221_v63 = vsel %vm1280_vm5, %v216_v52, %v220_v37  ;;  %v363_v0 = vor.u32 %v362_v54, %v359_v53  ;;  %v239_v1 = vrot.slane %v237_v55, 4  ;;  %v223_v2 = vshrl.u32 %v187_v56, 16  ;;  %v972_v3 = vld [vmem:[%s1252_s22 + $0x10] sm:$0xe]  ;;  %v973_v8 = vld [vmem:[%s1252_s22 + $0x14] sm:$0x1]  ;;  %1040 = vmatprep.subr.bf16.mxu0 %v1133_v46  ;;  %1065 = vmatprep.subr.bf16.mxu1 %v1133_v46 }
  0x22   : > { %v378_v5 = vrot.slane %v377_v57, 4  ;;  %v242_v6 = vrot.slane %v240_v59, 5  ;;  %v226_v7 = vshll.u32 %v187_v56, 16  ;;  %v248_v10 = vrot.slane %v246_v60, 5  ;;  %v970_v17 = vld [vmem:[%s1252_s22 + $0x8] sm:$0xe] }
  0x23   : > { %252 = vrot.lane.b32.xlu0 %v221_v63, %s1191_s3  ;;  %v364_v9 = vrot.slane %v363_v0, 4  ;;  %v225_v11 = vrot.slane %v223_v2, 4  ;;  %v232_v12 = vshll.u32 %v188_v61, 16  ;;  %v979_v16 = vrot.slane %v972_v3, 9  ;;  %v971_v18 = vld [vmem:[%s1252_s22 + $0xc] sm:$0x1] }
  0x24   : > { %v383_v13 = vsel %vm1280_vm5, %v378_v5, %v382_v48  ;;  %v243_v14 = vor.u32 %v242_v6, %v239_v1  ;;  %v228_v15 = vrot.slane %v226_v7, 5  ;;  %v451_v20 = vrot.slane %v973_v8, 5  ;;  %v273_v21 = vld [vmem:[%s1252_s22 + $0x18] sm:$0xe]  ;;  %v274_v22 = vld [vmem:[%s1252_s22 + $0x1c] sm:$0x1] }
  0x25   : > { %414 = vrot.lane.b32.xlu1 %v383_v13, %s1192_s6  ;;  %v369_v19 = vsel %vm1280_vm5, %v364_v9, %v368_v58  ;;  %v234_v26 = vrot.slane %v232_v12, 5  ;;  %v271_v27 = vld [vmem:[%s1252_s22 + $0x10] sm:$0xe]  ;;  %v978_v28 = vrot.slane %v970_v17, 9  ;;  %v447_v30 = vrot.slane %v971_v18, 5  ;;  %v1134_v3 = vld [vmem:[%s1530_s0 + $0x20] sm:$0xff]  }
  0x26   : > { %v244_v24 = vrot.slane %v243_v14, 4  ;;  %v229_v25 = vor.u32 %v228_v15, %v225_v11  ;;  %v272_v31 = vld [vmem:[%s1252_s22 + $0x14] sm:$0x1]  ;;  %v955_v35 = vrot.slane %v273_v21, 9  ;;  %v300_v36 = vrot.slane %v274_v22, 5  ;;  %v1135_v7 = vld [vmem:[%s1530_s0 + $0x58] sm:$0xff]   ;;  %1041 = vmatpush3.bf16.msra.mxu0 %v1134_v3  ;;  %1073 = vmatpush3.bf16.msra.mxu1 %v1134_v3 }
  0x27   : > { %412 = vrot.lane.b32.xlu0 %v369_v19, %s1192_s6  ;;  %v452_v37 = vsel %vm1260_vm4, %v979_v16, %v451_v20  ;;  %v954_v38 = vrot.slane %v271_v27, 9  ;;  %v990_v39 = vld [vmem:[%s1252_s22 + $0x18] sm:$0xf]  ;;  %v988_v40 = vld [vmem:[%s1252_s22 + $0x10] sm:$0xf]  ;;  %v296_v42 = vrot.slane %v272_v31, 5  ;;  %v448_v47 = vsel %vm1260_vm4, %v978_v28, %v447_v30  ;;  %1042 = vmatprep.subr.bf16.mxu0 %v1135_v7 }
  0x28   : > { %v249_v33 = vsel %vm1280_vm5, %v244_v24, %v248_v10  ;;  %v230_v34 = vrot.slane %v229_v25, 4  ;;  %v991_v43 = vld [vmem:[%s1252_s22 + $0x1c] sm:$0x1]  ;;  %v530_v44 = vshrl.u32 %v990_v39, 16  ;;  %v533_v45 = vshll.u32 %v990_v39, 16  ;;  %1066 = vmatprep.subr.bf16.mxu1 %v1135_v7  ;;  %v1142_v7 = vld [vmem:[%s1530_s0] sm:$0xff]  }
  0x29   : > { %256 = vrot.lane.b32.xlu1 %v249_v33, %s1191_s3  ;;  %v989_v48 = vld [vmem:[%s1252_s22 + $0x14] sm:$0x1]  ;;  %v516_v49 = vshrl.u32 %v988_v40, 16  ;;  %v519_v50 = vshll.u32 %v988_v40, 16  ;;  %v968_v51 = vld [vmem:[%s1252_s22 + $0x20] sm:$0xf]  ;;  %v301_v52 = vsel %vm1260_vm4, %v955_v35, %v300_v36  ;;  %v297_v8 = vsel %vm1260_vm4, %v954_v38, %v296_v42 }
  0x2a   : > { %v235_v41 = vsel %vm1280_vm5, %v230_v34, %v234_v26  ;;  %v532_v53 = vrot.slane %v530_v44, 4  ;;  %v535_v54 = vrot.slane %v533_v45, 5  ;;  %v969_v55 = vld [vmem:[%s1252_s22 + $0x24] sm:$0x1]  ;;  %v399_v56 = vshrl.u32 %v968_v51, 16  ;;  %v1136_v16 = vld [vmem:[%s1530_s0 + $0x18] sm:$0xff]  }
  0x2b   : > { %254 = vrot.lane.b32.xlu0 %v235_v41, %s1191_s3  ;;  %v539_v57 = vshll.u32 %v991_v43, 16  ;;  %v518_v58 = vrot.slane %v516_v49, 4  ;;  %v521_v59 = vrot.slane %v519_v50, 5  ;;  %v402_v60 = vshll.u32 %v968_v51, 16  ;;  %v966_v61 = vld [vmem:[%s1252_s22 + $0x18] sm:$0xf]  ;;  %1043 = vmatpush3.bf16.msra.mxu0 %v1136_v16 }
  0x2c   : > { %v536_v62 = vor.u32 %v535_v54, %v532_v53  ;;  %v525_v63 = vshll.u32 %v989_v48, 16  ;;  %v401_v0 = vrot.slane %v399_v56, 4  ;;  %v967_v1 = vld [vmem:[%s1252_s22 + $0x1c] sm:$0x1]  ;;  %v385_v2 = vshrl.u32 %v966_v61, 16  ;;  %1074 = vmatpush3.bf16.msra.mxu1 %v1136_v16  ;;  %v1138_v54 = vld [vmem:[%s1530_s0 + $0x10] sm:$0xff]  }
  0x2d   : > { %463 = vrot.lane.b32.xlu1 %v452_v37, %s1193_s20  ;;  %v404_v5 = vrot.slane %v402_v60, 5  ;;  %v388_v6 = vshll.u32 %v966_v61, 16  ;;  %v985_v9 = vld [vmem:[%s1252_s22 + $0x18] sm:$0xf]  ;;  %v522_v10 = vor.u32 %v521_v59, %v518_v58  ;;  %v408_v11 = vshll.u32 %v969_v55, 16  ;;  %v1139_v55 = vld [vmem:[%s1530_s0 + $0x48] sm:$0xff]  }
  0x2e   : > { %v387_v12 = vrot.slane %v385_v2, 4  ;;  %v394_v14 = vshll.u32 %v967_v1, 16  ;;  %v1364_v15 = vld [vmem:[%s1252_s22 + $0x20] sm:$0xe]  ;;  %v984_v17 = vld [vmem:[%s1252_s22 + $0x10] sm:$0xf] }
  0x2f   : > { %461 = vrot.lane.b32.xlu0 %v448_v47, %s1193_s20  ;;  %v390_v13 = vrot.slane %v388_v6, 5  ;;  %v537_v18 = vrot.slane %v536_v62, 4  ;;  %v541_v19 = vrot.slane %v539_v57, 5  ;;  %v527_v20 = vrot.slane %v525_v63, 5  ;;  %v1372_v22 = vld [vmem:[%s1252_s22 + $0x24] sm:$0x1] }
  0x30   : > { %v405_v21 = vor.u32 %v404_v5, %v401_v0  ;;  %v1375_v23 = vld [vmem:[%s1252_s22 + $0x18] sm:$0xe]  ;;  %v994_v24 = vld [vmem:[%s1252_s22 + $0x28] sm:$0xf]  ;;  %v961_v25 = vld [vmem:[%s1252_s22 + $0x20] sm:$0xf] }
  0x31   : > { %308 = vrot.lane.b32.xlu1 %v301_v52, %s1190_s24  ;;  %v523_v26 = vrot.slane %v522_v10, 4  ;;  %v410_v27 = vrot.slane %v408_v11, 5  ;;  %v391_v28 = vor.u32 %v390_v13, %v387_v12  ;;  %v981_v30 = vrot.slane %v1364_v15, 9  ;;  %v1384_v32 = vld [vmem:[%s1252_s22 + $0x1c] sm:$0x1]  ;;  %v1137_v47 = vld [vmem:[%s1530_s0 + $0x50] sm:$0xff]  }
  0x32   : > { %v1381_v31 = vrot.slane %v394_v14, 5  ;;  %v558_v33 = vshrl.u32 %v994_v24, 16  ;;  %v174_v34 = vld [vmem:[%s1252_s22] sm:$0xf]  ;;  %v960_v35 = vld [vmem:[%s1252_s22 + $0x18] sm:$0xf]  ;;  %v542_v48 = vsel %vm1280_vm5, %v537_v18, %v541_v19  ;;  %1044 = vmatprep.subr.bf16.mxu0 %v1137_v47  ;;  %1067 = vmatprep.subr.bf16.mxu1 %v1137_v47 }
  0x33   : > { %306 = vrot.lane.b32.xlu0 %v297_v8, %s1190_s24  ;;  %v406_v36 = vrot.slane %v405_v21, 4  ;;  %v459_v37 = vrot.slane %v1372_v22, 5  ;;  %v980_v38 = vrot.slane %v1375_v23, 9  ;;  %v561_v39 = vshll.u32 %v994_v24, 16  ;;  %179 = vst.msk [vmem:[#allocation2] sm:$0xf] %vm178_vm6, %v174_v34  ;;  %1045 = vmatpush3.bf16.msra.mxu0 %v1138_v54 }
  0x34   : > { %v175_v40 = vld [vmem:[%s1252_s22 + $0x8] sm:$0xf]  ;;  %v992_v41 = vld [vmem:[%s1252_s22 + $0x20] sm:$0xf]  ;;  %v177_v42 = vld [vmem:[%s1252_s22 + $0x18] sm:$0xf]  ;;  %v528_v52 = vsel %vm1280_vm5, %v523_v26, %v527_v20  ;;  %1075 = vmatpush3.bf16.msra.mxu1 %v1138_v54  ;;  %1046 = vmatprep.subr.bf16.mxu0 %v1139_v55 }
  0x35   : > { %492 = vrot.lane.b32.xlu1 %v985_v9, %s1194_s30  ;;  %180 = vst.msk [vmem:[#allocation2 + $0x8] sm:$0xf] %vm178_vm6, %v175_v40  ;;  %v176_v43 = vld [vmem:[%s1252_s22 + $0x10] sm:$0xf]  ;;  %v392_v44 = vrot.slane %v391_v28, 4  ;;  %v455_v45 = vrot.slane %v1384_v32, 5  ;;  %v411_v56 = vsel %vm1280_vm5, %v406_v36, %v410_v27  ;;  %1068 = vmatprep.subr.bf16.mxu1 %v1139_v55  ;;  %v460_v1 = vsel %vm1260_vm4, %v981_v30, %v459_v37 }
  0x36   : > { %182 = vst.msk [vmem:[#allocation2 + $0x18] sm:$0xf] %vm178_vm6, %v177_v42  ;;  %181 = vst.msk [vmem:[#allocation2 + $0x10] sm:$0xf] %vm178_vm6, %v176_v43  ;;  %v1401_v46 = vrot.slane %v558_v33, 4  ;;  %v1411_v50 = vrot.slane %v561_v39, 5 }
  0x37   : > { %490 = vrot.lane.b32.xlu0 %v984_v17, %s1194_s30  ;;  %v1409_v49 = vld [vmem:[%s1252_s22 + $0x2c] sm:$0x1]  ;;  %v544_v51 = vshrl.u32 %v992_v41, 16  ;;  %v547_v53 = vshll.u32 %v992_v41, 16  ;;  %v993_v57 = vld [vmem:[%s1252_s22 + $0x24] sm:$0x1]  ;;  %v397_v62 = vsel %vm1280_vm5, %v392_v44, %v1381_v31  ;;  %v456_v12 = vsel %vm1260_vm4, %v980_v38, %v455_v45 }
  0x38   : > { %v1140_v58 = vld [vmem:[%s1530_s0 + $0x8] sm:$0xff]   ;;  %v567_v59 = vshll.u32 %v1409_v49, 16  ;;  %v1141_v60 = vld [vmem:[%s1530_s0 + $0x40] sm:$0xff]   ;;  %v1196_v61 = vmov 0   ;;  %v996_v2 = vld [vmem:[%s1252_s22 + $0x10] sm:$0xe]  ;;  %v564_v6 = vor.u32 %v1411_v50, %v1401_v46 }
  0x39   : > { %337 = vrot.lane.b32.xlu1 %v961_v25, %s1189_s23  ;;  %167 = vst.msk [vmem:[#allocation2 + $0x4] sm:$0xf] %vm166_vm7, %v1196_v61  ;;  %168 = vst.msk [vmem:[#allocation2 + $0xc] sm:$0xf] %vm166_vm7, %v1196_v61  ;;  %v546_v63 = vrot.slane %v544_v51, 4  ;;  %v549_v0 = vrot.slane %v547_v53, 5  ;;  %1047 = vmatpush3.bf16.msra.mxu0 %v1140_v58 }
  0x3a   : > { %169 = vst.msk [vmem:[#allocation2 + $0x14] sm:$0xf] %vm166_vm7, %v1196_v61  ;;  %170 = vst.msk [vmem:[#allocation2 + $0x1c] sm:$0xf] %vm166_vm7, %v1196_v61  ;;  %v997_v3 = vld [vmem:[%s1252_s22 + $0x14] sm:$0x1]  ;;  %1076 = vmatpush3.bf16.msra.mxu1 %v1140_v58  ;;  %1048 = vmatprep.subr.bf16.mxu0 %v1141_v60 }
  0x3b   : > { %335 = vrot.lane.b32.xlu0 %v960_v35, %s1189_s23  ;;  %v998_v5 = vld [vmem:[%s1252_s22 + $0x18] sm:$0xe]  ;;  %v999_v8 = vld [vmem:[%s1252_s22 + $0x1c] sm:$0x1]  ;;  %v1004_v9 = vrot.slane %v996_v2, 9  ;;  %v606_v10 = vrot.slane %v997_v3, 5  ;;  %v550_v17 = vor.u32 %v549_v0, %v546_v63  ;;  %1069 = vmatprep.subr.bf16.mxu1 %v1141_v60 }
  0x3c   : > { %v1005_v11 = vrot.slane %v998_v5, 9  ;;  %v553_v13 = vshll.u32 %v993_v57, 16  ;;  %v610_v14 = vrot.slane %v999_v8, 5  ;;  %v1000_v15 = vld [vmem:[%s1252_s22 + $0x20] sm:$0xe]  ;;  %v565_v27 = vrot.slane %v564_v6, 4 }
  0x3d   : > { %573 = vrot.lane.b32.xlu1 %v542_v48, %s1195_s7  ;;  %v1001_v16 = vld [vmem:[%s1252_s22 + $0x24] sm:$0x1]  ;;  %v607_v18 = vsel %vm1260_vm4, %v1004_v9, %v606_v10  ;;  %v1002_v19 = vld [vmem:[%s1252_s22 + $0x28] sm:$0xe]  ;;  %v1003_v20 = vld [vmem:[%s1252_s22 + $0x2c] sm:$0x1]  ;;  %1049 = vmatpush3.bf16.msra.mxu0 %v1142_v7 }
  0x3e   : > { %v1006_v21 = vrot.slane %v1000_v15, 9  ;;  %v614_v22 = vrot.slane %v1001_v16, 5  ;;  %v611_v23 = vsel %vm1260_vm4, %v1005_v11, %v610_v14  ;;  %624 = vst.msk [vmem:[#allocation2 + $0x4] sm:$0xf] %vm178_vm6, %v607_v18  ;;  %v1007_v24 = vrot.slane %v1002_v19, 9  ;;  %1077 = vmatpush3.bf16.msra.mxu1 %v1142_v7 }
  0x3f   : > { %571 = vrot.lane.b32.xlu0 %v528_v52, %s1195_s7  ;;  %v618_v25 = vrot.slane %v1003_v20, 5  ;;  %v987_v26 = vld [vmem:[%s1252_s22 + $0x28] sm:$0xf]  ;;  %v569_v28 = vrot.slane %v567_v59, 5  ;;  %625 = vst.msk [vmem:[#allocation2 + $0xc] sm:$0xf] %vm178_vm6, %v611_v23 }
  0x40   : > { %v615_v30 = vsel %vm1260_vm4, %v1006_v21, %v614_v22  ;;  %v986_v32 = vld [vmem:[%s1252_s22 + $0x20] sm:$0xf]  ;;  %v551_v33 = vrot.slane %v550_v17, 4  ;;  %v555_v34 = vrot.slane %v553_v13, 5  ;;  %s947_s22 = sshll.u32 %s1175_s10, 1 }
  0x41   : > { %418 = vrot.lane.b32.xlu1 %v411_v56, %s1192_s6  ;;  %v619_v31 = vsel %vm1260_vm4, %v1007_v24, %v618_v25  ;;  %626 = vst.msk [vmem:[#allocation2 + $0x14] sm:$0xf] %vm178_vm6, %v615_v30  ;;  %v570_v35 = vsel %vm1280_vm5, %v565_v27, %v569_v28 }
  0x42   : > { %627 = vst.msk [vmem:[#allocation2 + $0x1c] sm:$0xf] %vm178_vm6, %v619_v31  ;;  %v556_v36 = vsel %vm1280_vm5, %v551_v33, %v555_v34 }
  0x43   : > { %416 = vrot.lane.b32.xlu0 %v397_v62, %s1192_s6  ;;  %s157_s6 = sadd.s32 %s1171_s9, %s947_s22 }
  0x44   : > { %p158_p6 = scmp.lt.s32.totalorder %s157_s6, 3 }
  0x45   : > { %467 = vrot.lane.b32.xlu1 %v460_v1, %s1193_s20 }
  0x46   : > { %v1145_v60 = vld [vmem:[#allocation2 + $0x4] ss:$8 sps:$4 sm:$0xff]   ;;  %s1548_s6 = smov (!%p158_p6, %s157_s6), 3 }
  0x47   : > { %465 = vrot.lane.b32.xlu0 %v456_v12, %s1193_s20  ;;  %812 = vmatprep.mubr.bf16.mxu0 %v1145_v60  ;;  %s948_s20 = sshll.u32 %s1548_s6, 1 }
  0x48   : > { %s161_s28 = scalar_lea.vmem %s1532_s2, %s948_s20 }
  0x49   : > { %496 = vrot.lane.b32.xlu1 %v987_v26, %s1194_s30  ;;  %v1148_v2 = vld [vmem:[#allocation2 + $0x14] ss:$8 sps:$4 sm:$0xff]  }
  0x4a   : > { %820 = vmatprep.mubr.bf16.mxu1 %v1148_v2 }
  0x4b   : > { %494 = vrot.lane.b32.xlu0 %v986_v32, %s1194_s30 }
  0x4d   : > { %577 = vrot.lane.b32.xlu1 %v570_v35, %s1195_s7 }
  0x4f   : > { %575 = vrot.lane.b32.xlu0 %v556_v36, %s1195_s7 }
  0x87   : > { %v334_v4 = vpop.permute.xlu1 %333  ;;  %v332_v37 = vpop.permute.xlu0 %331 }
  0x8b   : > { %v303_v38 = vpop.permute.xlu1 %302 }
  0x8f   : > { %v305_v40 = vpop.permute.xlu1 %304 }
  0x91   : > { %v251_v39 = vpop.permute.xlu0 %250 }
  0x92   : > { %263 = vst.msk [vmem:[#allocation2] sm:$0xf] %vm262_vm8, %v251_v39 }
  0x93   : > { %315 = vst.msk [vmem:[#allocation2] sm:$0xf] %vm314_vm9, %v303_v38 }
  0x94   : > { %344 = vst.msk [vmem:[#allocation2] sm:$0xf] %vm343_vm10, %v332_v37 }
  0x95   : > { %v253_v29 = vpop.permute.xlu0 %252 }
  0x96   : > { %264 = vst.msk [vmem:[#allocation2 + $0x8] sm:$0xf] %vm262_vm8, %v253_v29 }
  0x97   : > { %316 = vst.msk [vmem:[#allocation2 + $0x8] sm:$0xf] %vm314_vm9, %v305_v40  ;;  %v415_v41 = vpop.permute.xlu1 %414 }
  0x98   : > { %345 = vst.msk [vmem:[#allocation2 + $0x8] sm:$0xf] %vm343_vm10, %v334_v4 }
  0x99   : > { %426 = vst.msk [vmem:[#allocation2 + $0x8] sm:$0xf] %vm424_vm11, %v415_v41  ;;  %v413_v42 = vpop.permute.xlu0 %412 }
  0x9a   : > { %425 = vst.msk [vmem:[#allocation2] sm:$0xf] %vm424_vm11, %v413_v42 }
  0x9b   : > { %v257_v43 = vpop.permute.xlu1 %256 }
  0x9c   : > { %266 = vst.msk [vmem:[#allocation2 + $0x18] sm:$0xf] %vm262_vm8, %v257_v43 }
  0x9d   : > { %v255_v44 = vpop.permute.xlu0 %254 }
  0x9e   : > { %265 = vst.msk [vmem:[#allocation2 + $0x10] sm:$0xf] %vm262_vm8, %v255_v44 }
  0x9f   : > { %v464_v45 = vpop.permute.xlu1 %463 }
  0xa0   : > { %475 = vst.msk [vmem:[#allocation2 + $0x8] sm:$0xf] %vm473_vm12, %v464_v45 }
  0xa1   : > { %v462_v46 = vpop.permute.xlu0 %461 }
  0xa2   : > { %474 = vst.msk [vmem:[#allocation2] sm:$0xf] %vm473_vm12, %v462_v46 }
  0xa3   : > { %v309_v47 = vpop.permute.xlu1 %308 }
  0xa4   : > { %318 = vst.msk [vmem:[#allocation2 + $0x18] sm:$0xf] %vm314_vm9, %v309_v47 }
  0xa5   : > { %v307_v48 = vpop.permute.xlu0 %306 }
  0xa6   : > { %317 = vst.msk [vmem:[#allocation2 + $0x10] sm:$0xf] %vm314_vm9, %v307_v48 }
  0xa7   : > { %v493_v49 = vpop.permute.xlu1 %492 }
  0xa8   : > { %504 = vst.msk [vmem:[#allocation2 + $0x8] sm:$0xf] %vm502_vm13, %v493_v49 }
  0xa9   : > { %v491_v50 = vpop.permute.xlu0 %490 }
  0xaa   : > { %503 = vst.msk [vmem:[#allocation2] sm:$0xf] %vm502_vm13, %v491_v50 }
  0xab   : > { %v338_v51 = vpop.permute.xlu1 %337 }
  0xac   : > { %347 = vst.msk [vmem:[#allocation2 + $0x18] sm:$0xf] %vm343_vm10, %v338_v51 }
  0xad   : > { %v336_v52 = vpop.permute.xlu0 %335 }
  0xae   : > { %346 = vst.msk [vmem:[#allocation2 + $0x10] sm:$0xf] %vm343_vm10, %v336_v52 }
  0xaf   : > { %v574_v53 = vpop.permute.xlu1 %573 }
  0xb0   : > { %585 = vst.msk [vmem:[#allocation2 + $0x8] sm:$0xf] %vm583_vm14, %v574_v53 }
  0xb1   : > { %v572_v54 = vpop.permute.xlu0 %571 }
  0xb2   : > { %584 = vst.msk [vmem:[#allocation2] sm:$0xf] %vm583_vm14, %v572_v54 }
  0xb3   : > { %v419_v55 = vpop.permute.xlu1 %418 }
  0xb4   : > { %428 = vst.msk [vmem:[#allocation2 + $0x18] sm:$0xf] %vm424_vm11, %v419_v55 }
  0xb5   : > { %v417_v56 = vpop.permute.xlu0 %416 }
  0xb6   : > { %427 = vst.msk [vmem:[#allocation2 + $0x10] sm:$0xf] %vm424_vm11, %v417_v56 }
  0xb7   : > { %v468_v57 = vpop.permute.xlu1 %467 }
  0xb8   : > { %477 = vst.msk [vmem:[#allocation2 + $0x18] sm:$0xf] %vm473_vm12, %v468_v57 }
  0xb9   : > { %v466_v58 = vpop.permute.xlu0 %465  ;;  %v1143_v59 = vld [vmem:[#allocation2] ss:$8 sps:$4 sm:$0xff]  }
  0xba   : > { %476 = vst.msk [vmem:[#allocation2 + $0x10] sm:$0xf] %vm473_vm12, %v466_v58  ;;  %813 = vmatmul.mubr.bf16.vlgmr.msra.gmra.mxu0 %v1143_v59 }
  0xbb   : > { %v497_v61 = vpop.permute.xlu1 %496 }
  0xbc   : > { %506 = vst.msk [vmem:[#allocation2 + $0x18] sm:$0xf] %vm502_vm13, %v497_v61 }
  0xbd   : > { %v495_v62 = vpop.permute.xlu0 %494 }
  0xbe   : > { %505 = vst.msk [vmem:[#allocation2 + $0x10] sm:$0xf] %vm502_vm13, %v495_v62 }
  0xbf   : > { %v578_v63 = vpop.permute.xlu1 %577 }
  0xc0   : > { %587 = vst.msk [vmem:[#allocation2 + $0x18] sm:$0xf] %vm583_vm14, %v578_v63 }
  0xc1   : > { %v576_v0 = vpop.permute.xlu0 %575 }
  0xc2   : > { %586 = vst.msk [vmem:[#allocation2 + $0x10] sm:$0xf] %vm583_vm14, %v576_v0 }
  0xc9   : > { %v1146_v1 = vld [vmem:[#allocation2 + $0x10] ss:$8 sps:$4 sm:$0xff]  }
  0xca   : > { %821 = vmatmul.mubr.bf16.vlgmr.msra.gmra.mxu1 %v1146_v1 }
 0x17a   : > { %v1050_v3 = vpop.f32.mrf.mxu0 }
 0x17c   : > { %v1051_v5 = vpop.f32.mrf.mxu0 }
 0x17d   : > { %v1052_v11 = vadd.f32 %v1051_v5, %v1050_v3 }
 0x17e   : > { %v1053_v6 = vpop.f32.mrf.mxu0 }
 0x180   : > { %v1054_v7 = vpop.f32.mrf.mxu0 }
 0x181   : > { %v1055_v9 = vadd.f32 %v1054_v7, %v1053_v6 }
 0x183   : > { %v829_v14 = vadd.f32 %v1055_v9, %v1052_v11 }
 0x18a   : > { %v1056_v8 = vpop.f32.mrf.mxu1 }
 0x18c   : > { %v1057_v10 = vpop.f32.mrf.mxu1 }
 0x18d   : > { %v1058_v12 = vadd.f32 %v1057_v10, %v1056_v8 }
 0x18e   : > { %v1059_v13 = vpop.f32.mrf.mxu1 }
 0x18f   : > { %v830_v16 = vadd.f32 %v1058_v12, %v829_v14 }
 0x190   : > { %v1060_v15 = vpop.f32.mrf.mxu1 }
 0x191   : > { %v1061_v17 = vadd.f32 %v1060_v15, %v1059_v13 }
 0x193   : > { %v831_v18 = vadd.f32 %v1061_v17, %v830_v16 }
 0x195   : > { %v832_v19 = vrot.slane %v831_v18, 4 }
 0x197   : > { %v833_v20 = vadd.f32 %v832_v19, %v831_v18 }
 0x199   : > { %v834_v21 = vrot.slane %v833_v20, 2 }
 0x19b   : > { %v835_v22 = vadd.f32 %v834_v21, %v833_v20 }
 0x19d   : > { %v836_v23 = vrot.slane %v835_v22, 1 }
 0x19f   : > { %v837_v24 = vadd.f32 %v836_v23, %v835_v22 }
 0x1a1   : > { %v838_v25 = vmul.f32 0.03125, %v837_v24  ;;  %856 = vst [vmem:[%s161_s28] sm:$0x1] %v837_v24 }
 0x1a3   : > { %v839_v26 = vsub.f32 %v1052_v11, %v838_v25  ;;  %v840_v27 = vsub.f32 %v1055_v9, %v838_v25  ;;  %v841_v28 = vsub.f32 %v1058_v12, %v838_v25  ;;  %v842_v30 = vsub.f32 %v1061_v17, %v838_v25 }
 0x1a5   : > { %v843_v31 = vmul.f32 %v839_v26, %v839_v26  ;;  %v844_v32 = vmul.f32 %v840_v27, %v840_v27  ;;  %v845_v33 = vmul.f32 %v841_v28, %v841_v28  ;;  %v846_v35 = vmul.f32 %v842_v30, %v842_v30 }
 0x1a7   : > { %v847_v34 = vadd.f32 %v844_v32, %v843_v31 }
 0x1a9   : > { %v848_v36 = vadd.f32 %v847_v34, %v845_v33 }
 0x1ab   : > { %v849_v4 = vadd.f32 %v848_v36, %v846_v35 }
 0x1ad   : > { %v850_v37 = vrot.slane %v849_v4, 4 }
 0x1af   : > { %v851_v38 = vadd.f32 %v850_v37, %v849_v4 }
 0x1b1   : > { %v852_v39 = vrot.slane %v851_v38, 2 }
 0x1b3   : > { %v853_v40 = vadd.f32 %v852_v39, %v851_v38 }
 0x1b5   : > { %v854_v29 = vrot.slane %v853_v40, 1 }
 0x1b7   : > { %v855_v41 = vadd.f32 %v854_v29, %v853_v40 }
 0x1b9   : > { %857 = vst [vmem:[%s161_s28 + $0x1] sm:$0x1] %v855_v41 }
 0x1ba PF: > { %s12_s13 = sadd.s32 1, %s1187_s13   ;;  %s1537_s9 = smov %s1179_s11 }
 0x1bb   : > { %p9_p7 = scmp.ge.s32.totalorder %s12_s13, 6   ;;  %s1538_s10 = smov %s1183_s12 }
 0x1bc   : > { %s1539_s11 = smov %s1542_s14  ;;  %s1540_s12 = smov %s1546_s15 }
 0x1bd   :  { %11 = sbr.rel (!%p9_p7) target bundleno = 3 (0x3), region = 61 }

// kernel: encoder_block_forward.3
= control target key start
LH: loop header
LB: loop body
LE: loop exit
PB: predicated region body
PF: predicated region fallthrough
CT: control target
= control target key end

     0   :  { %s1295_s15 = smov 0   ;;  %s1297_s16 = smov 0   ;;  %s1587_s0 = inlined_call_operand.vmem [shape: bf16[256,128], index: 0, kind: input, shape index: {}]   ;;  %s1588_s1 = inlined_call_operand.vmem [shape: bf16[2,10,10,16], index: 1, kind: input, shape index: {}]   ;;  %s1589_s2 = inlined_call_operand.vmem [shape: f32[1,128], index: 2, kind: input, shape index: {}]   ;;  %s1590_s3 = inlined_call_operand.vmem [shape: f32[1,128], index: 3, kind: input, shape index: {}]   ;;  %s1591_s4 = inlined_call_operand.vmem [shape: f32[2,8,8,8], index: 4, kind: output, shape index: {}]  }
   0x1   :  { %s1299_s17 = smov 0   ;;  %s1301_s18 = smov 0  }
   0x2   :  { %s1303_s19 = smov 0  }
   0x3 LB: > { %s23_s20 = sadd.s32 1, %s1252_s17  ;;  %s26_s21 = sadd.s32 1, %s1256_s18  ;;  %s1260_s19 = sphi %s1303_s19, %s14_s19   ;;  %s1256_s18 = sphi %s1301_s18, %s1599_s18   ;;  %s1252_s17 = sphi %s1299_s17, %s1598_s17   ;;  %s1248_s16 = sphi %s1297_s16, %s1597_s16   ;;  %s1244_s15 = sphi %s1295_s15, %s1596_s15  }
   0x4   : > { %p24_p0 = scmp.ge.s32.totalorder %s23_s20, 2  ;;  %p1015_p1 = scmp.ge.s32.totalorder %s1260_s19, 1 }
   0x5   : > { %p176_p2 = scmp.lt.s32.totalorder %s1260_s19, 5 }
   0x6   : > { %s1601_s20 = smov (%p24_p0, %s23_s20), 0  ;;  %s1603_s21 = smov (!%p24_p0, %s26_s21), %s1256_s18 }
   0x7   : > { %p177_p3 = pnand %p1015_p1, %p176_p2  ;;  %p28_p4 = scmp.ge.s32.totalorder %s1603_s21, 2 }
   0x8   : > { %p206_p5 = scmp.lt.s32.totalorder (!%p177_p3), %s1248_s16, 1  ;;  %s1104_s23 = sshll.u32 (!%p177_p3), %s1244_s15, 5 }
   0x9   : > { %s1605_s21 = smov (%p28_p4, %s1603_s21), 0  ;;  %180 = sbr.rel (%p177_p3) target bundleno = 407 (0x197), region = 36 }
   0xa   : > { %s1262_s28 = smov (!%p177_p3), 48   ;;  %s1263_s29 = smov (!%p177_p3), 32  }
   0xb   : > { %s1264_s30 = smov (!%p177_p3), 16   ;;  %s1265_s13 = smov (!%p177_p3), 64  }
   0xe   : > { %s1607_s16 = smov (!%p206_p5, %s1248_s16), 1  ;;  %vm340_vm0 = vcmask 1042432   ;;  %vm341_vm1 = vcmask 1046532   ;;  %vm248_vm2 = vsmask.f32 3328  ;;  %vm235_vm6 = vcmask 125952  }
   0xf   : > { %s1151_s22 = smul.u32 80, %s1607_s16  ;;  %vm249_vm3 = vsmask.f32 7440  ;;  %vm1342_vm4 = vmor %vm340_vm0, %vm341_vm1  ;;  %vm223_vm7 = vcmask 1043584   ;;  %vm319_vm8 = vcmask 257152   ;;  %vm371_vm9 = vcmask 388352  }
  0x10   : > { %vm1369_vm5 = vmor %vm248_vm2, %vm249_vm3  ;;  %vm400_vm10 = vcmask 519552   ;;  %vm481_vm11 = vcmask 650752   ;;  %vm530_vm12 = vcmask 781952   ;;  %vm559_vm13 = vcmask 913152   ;;  %s1018_s5 = sshll.u32 %s1607_s16, 3 }
  0x11   : > { %s210_s26 = scalar_lea.vmem %s1588_s1, %s1151_s22  ;;  %vm640_vm14 = vcmask 1044352   ;;  %vm912_vm15 = vcmask 64512  }
  0x12   : > { %s1334_s27 = scalar_lea.vmem %s210_s26, %s1104_s23 }
  0x13   : > { %v1030_v0 = vld [vmem:[%s1334_s27 + $0x10] sm:$0xf]  ;;  %v1029_v1 = vld [vmem:[%s1334_s27 + $0x8] sm:$0xf]  ;;  %v327_v3 = vld [vmem:[%s1334_s27 + $0xc] sm:$0x1] }
  0x14   : > { %v326_v2 = vld [vmem:[%s1334_s27 + $0x8] sm:$0xe]  ;;  %390 = vrot.lane.b32.xlu1 %v1030_v0, %s1262_s28  ;;  %388 = vrot.lane.b32.xlu0 %v1029_v1, %s1262_s28  ;;  %v324_v6 = vld [vmem:[%s1334_s27] sm:$0xe]  ;;  %v349_v7 = vrot.slane %v327_v3, 5 }
  0x15   : > { %v1024_v5 = vrot.slane %v326_v2, 9  ;;  %v325_v8 = vld [vmem:[%s1334_s27 + $0x4] sm:$0x1]  ;;  %v1023_v9 = vrot.slane %v324_v6, 9  ;;  %v330_v10 = vld [vmem:[%s1334_s27 + $0x18] sm:$0xe] }
  0x16   : > { %v345_v11 = vrot.slane %v325_v8, 5  ;;  %v331_v12 = vld [vmem:[%s1334_s27 + $0x1c] sm:$0x1]  ;;  %v1026_v13 = vrot.slane %v330_v10, 9  ;;  %v328_v14 = vld [vmem:[%s1334_s27 + $0x10] sm:$0xe] }
  0x17   : > { %v350_v15 = vsel %vm1342_vm4, %v1024_v5, %v349_v7  ;;  %v357_v16 = vrot.slane %v331_v12, 5  ;;  %v329_v17 = vld [vmem:[%s1334_s27 + $0x14] sm:$0x1]  ;;  %v1025_v18 = vrot.slane %v328_v14, 9  ;;  %v244_v19 = vld [vmem:[%s1334_s27 + $0x10] sm:$0xf] }
  0x18   : > { %361 = vrot.lane.b32.xlu1 %v350_v15, %s1263_s29  ;;  %v346_v20 = vsel %vm1342_vm4, %v1023_v9, %v345_v11  ;;  %v353_v21 = vrot.slane %v329_v17, 5  ;;  %v245_v22 = vld [vmem:[%s1334_s27 + $0x14] sm:$0x1]  ;;  %v280_v23 = vshrl.u32 %v244_v19, 16  ;;  %v283_v24 = vshll.u32 %v244_v19, 16  ;;  %v1200_v15 = vld [vmem:[%s1587_s0 + $0x78] sm:$0xff]  }
  0x19   : > { %359 = vrot.lane.b32.xlu0 %v346_v20, %s1263_s29  ;;  %v358_v25 = vsel %vm1342_vm4, %v1026_v13, %v357_v16  ;;  %v289_v26 = vshll.u32 %v245_v22, 16  ;;  %v240_v27 = vld [vmem:[%s1334_s27] sm:$0xf]  ;;  %v241_v28 = vld [vmem:[%s1334_s27 + $0x4] sm:$0x1]  ;;  %1107 = vmatprep.subr.bf16.mxu0 %v1200_v15 }
  0x1a   : > { %v354_v29 = vsel %vm1342_vm4, %v1025_v18, %v353_v21  ;;  %v282_v30 = vrot.slane %v280_v23, 4  ;;  %v285_v31 = vrot.slane %v283_v24, 5  ;;  %v252_v32 = vshrl.u32 %v240_v27, 16  ;;  %v246_v33 = vld [vmem:[%s1334_s27 + $0x18] sm:$0xf]  ;;  %1135 = vmatprep.subr.bf16.mxu1 %v1200_v15  ;;  %v1204_v15 = vld [vmem:[%s1587_s0 + $0x68] sm:$0xff]  }
  0x1b   : > { %v291_v34 = vrot.slane %v289_v26, 5  ;;  %v255_v35 = vshll.u32 %v240_v27, 16  ;;  %v261_v36 = vshll.u32 %v241_v28, 16  ;;  %v247_v37 = vld [vmem:[%s1334_s27 + $0x1c] sm:$0x1]  ;;  %v294_v38 = vshrl.u32 %v246_v33, 16 }
  0x1c   : > { %365 = vrot.lane.b32.xlu1 %v358_v25, %s1263_s29  ;;  %v286_v39 = vor.u32 %v285_v31, %v282_v30  ;;  %v254_v40 = vrot.slane %v252_v32, 4  ;;  %v297_v41 = vshll.u32 %v246_v33, 16  ;;  %v303_v42 = vshll.u32 %v247_v37, 16  ;;  %v242_v43 = vld [vmem:[%s1334_s27 + $0x8] sm:$0xf]  ;;  %v1201_v21 = vld [vmem:[%s1587_s0 + $0x38] sm:$0xff]  }
  0x1d   : > { %363 = vrot.lane.b32.xlu0 %v354_v29, %s1263_s29  ;;  %v257_v45 = vrot.slane %v255_v35, 5  ;;  %v296_v46 = vrot.slane %v294_v38, 4  ;;  %v243_v47 = vld [vmem:[%s1334_s27 + $0xc] sm:$0x1]  ;;  %v266_v48 = vshrl.u32 %v242_v43, 16  ;;  %v263_v50 = vrot.slane %v261_v36, 5  ;;  %1108 = vmatpush3.bf16.msra.mxu0 %v1201_v21 }
  0x1e   : > { %v287_v49 = vrot.slane %v286_v39, 4  ;;  %v299_v51 = vrot.slane %v297_v41, 5  ;;  %v269_v52 = vshll.u32 %v242_v43, 16  ;;  %v305_v54 = vrot.slane %v303_v42, 5  ;;  %v1035_v57 = vld [vmem:[%s1334_s27 + $0x10] sm:$0xf]  ;;  %1143 = vmatpush3.bf16.msra.mxu1 %v1201_v21 }
  0x1f   : > { %v258_v53 = vor.u32 %v257_v45, %v254_v40  ;;  %v268_v55 = vrot.slane %v266_v48, 4  ;;  %v275_v56 = vshll.u32 %v243_v47, 16  ;;  %v1036_v61 = vld [vmem:[%s1334_s27 + $0x14] sm:$0x1]  ;;  %v428_v62 = vshrl.u32 %v1035_v57, 16  ;;  %v1205_v21 = vld [vmem:[%s1587_s0 + $0x28] sm:$0xff]  }
  0x20   : > { %v292_v58 = vsel %vm1369_vm5, %v287_v49, %v291_v34  ;;  %v300_v59 = vor.u32 %v299_v51, %v296_v46  ;;  %v271_v60 = vrot.slane %v269_v52, 5  ;;  %v1033_v63 = vld [vmem:[%s1334_s27 + $0x8] sm:$0xf]  ;;  %v431_v2 = vshll.u32 %v1035_v57, 16  ;;  %v1034_v5 = vld [vmem:[%s1334_s27 + $0xc] sm:$0x1] }
  0x21   : > { %311 = vrot.lane.b32.xlu1 %v292_v58, %s1264_s30  ;;  %v259_v0 = vrot.slane %v258_v53, 4  ;;  %v277_v1 = vrot.slane %v275_v56, 5  ;;  %v437_v3 = vshll.u32 %v1036_v61, 16  ;;  %v430_v8 = vrot.slane %v428_v62, 4  ;;  %v1039_v10 = vld [vmem:[%s1334_s27 + $0x20] sm:$0xf] }
  0x22   : > { %v301_v6 = vrot.slane %v300_v59, 4  ;;  %v272_v7 = vor.u32 %v271_v60, %v268_v55  ;;  %v414_v9 = vshrl.u32 %v1033_v63, 16  ;;  %v433_v12 = vrot.slane %v431_v2, 5  ;;  %v1040_v14 = vld [vmem:[%s1334_s27 + $0x24] sm:$0x1]  ;;  %v1202_v37 = vld [vmem:[%s1587_s0 + $0x70] sm:$0xff]  }
  0x23   : > { %v264_v11 = vsel %vm1369_vm5, %v259_v0, %v263_v50  ;;  %v417_v13 = vshll.u32 %v1033_v63, 16  ;;  %v423_v19 = vshll.u32 %v1034_v5, 16  ;;  %v1037_v20 = vld [vmem:[%s1334_s27 + $0x18] sm:$0xf]  ;;  %v456_v24 = vshrl.u32 %v1039_v10, 16  ;;  %1109 = vmatprep.subr.bf16.mxu0 %v1202_v37  ;;  %1136 = vmatprep.subr.bf16.mxu1 %v1202_v37  ;;  %v1203_v55 = vld [vmem:[%s1587_s0 + $0x30] sm:$0xff]  }
  0x24   : > { %307 = vrot.lane.b32.xlu0 %v264_v11, %s1264_s30  ;;  %v306_v16 = vsel %vm1369_vm5, %v301_v6, %v305_v54  ;;  %v273_v17 = vrot.slane %v272_v7, 4  ;;  %v416_v18 = vrot.slane %v414_v9, 4  ;;  %v434_v22 = vor.u32 %v433_v12, %v430_v8  ;;  %v1038_v26 = vld [vmem:[%s1334_s27 + $0x1c] sm:$0x1]  ;;  %v1032_v28 = vld [vmem:[%s1334_s27 + $0x20] sm:$0xf]  ;;  %1110 = vmatpush3.bf16.msra.mxu0 %v1203_v55 }
  0x25   : > { %313 = vrot.lane.b32.xlu1 %v306_v16, %s1264_s30  ;;  %v419_v23 = vrot.slane %v417_v13, 5  ;;  %v459_v25 = vshll.u32 %v1039_v10, 16  ;;  %v439_v29 = vrot.slane %v437_v3, 5  ;;  %v465_v30 = vshll.u32 %v1040_v14, 16  ;;  %v1031_v32 = vld [vmem:[%s1334_s27 + $0x18] sm:$0xf]  ;;  %1144 = vmatpush3.bf16.msra.mxu1 %v1203_v55 }
  0x26   : > { %v278_v27 = vsel %vm1369_vm5, %v273_v17, %v277_v1  ;;  %v442_v31 = vshrl.u32 %v1037_v20, 16  ;;  %v435_v33 = vrot.slane %v434_v22, 4  ;;  %v458_v35 = vrot.slane %v456_v24, 4  ;;  %v1043_v41 = vld [vmem:[%s1334_s27 + $0x10] sm:$0xe]  ;;  %1111 = vmatprep.subr.bf16.mxu0 %v1204_v15  ;;  %1137 = vmatprep.subr.bf16.mxu1 %v1204_v15 }
  0x27   : > { %v420_v34 = vor.u32 %v419_v23, %v416_v18  ;;  %v461_v36 = vrot.slane %v459_v25, 5  ;;  %v445_v39 = vshll.u32 %v1037_v20, 16  ;;  %v451_v40 = vshll.u32 %v1038_v26, 16  ;;  %v1044_v46 = vld [vmem:[%s1334_s27 + $0x14] sm:$0x1] }
  0x28   : > { %309 = vrot.lane.b32.xlu0 %v278_v27, %s1264_s30  ;;  %v444_v38 = vrot.slane %v442_v31, 4  ;;  %v425_v43 = vrot.slane %v423_v19, 5  ;;  %v1409_v47 = vld [vmem:[%s1334_s27 + $0x8] sm:$0xe]  ;;  %v440_v48 = vsel %vm1369_vm5, %v435_v33, %v439_v29  ;;  %v467_v49 = vrot.slane %v465_v30, 5  ;;  %1112 = vmatpush3.bf16.msra.mxu0 %v1205_v21  ;;  %v1206_v29 = vld [vmem:[%s1587_s0 + $0x60] sm:$0xff]  }
  0x29   : > { %394 = vrot.lane.b32.xlu1 %v1032_v28, %s1262_s28  ;;  %v421_v42 = vrot.slane %v420_v34, 4  ;;  %v462_v45 = vor.u32 %v461_v36, %v458_v35  ;;  %v447_v50 = vrot.slane %v445_v39, 5  ;;  %v1042_v51 = vld [vmem:[%s1334_s27 + $0xc] sm:$0x1]  ;;  %v1047_v52 = vld [vmem:[%s1334_s27 + $0x20] sm:$0xe]  ;;  %1145 = vmatpush3.bf16.msra.mxu1 %v1205_v21 }
  0x2a   : > { %v1048_v54 = vld [vmem:[%s1334_s27 + $0x24] sm:$0x1]  ;;  %v453_v57 = vrot.slane %v451_v40, 5  ;;  %v1050_v58 = vrot.slane %v1043_v41, 9  ;;  %v508_v59 = vrot.slane %v1044_v46, 5  ;;  %v1049_v61 = vrot.slane %v1409_v47, 9  ;;  %1113 = vmatprep.subr.bf16.mxu0 %v1206_v29  ;;  %1138 = vmatprep.subr.bf16.mxu1 %v1206_v29 }
  0x2b   : > { %v463_v53 = vrot.slane %v462_v45, 4  ;;  %v448_v56 = vor.u32 %v447_v50, %v444_v38  ;;  %v426_v60 = vsel %vm1369_vm5, %v421_v42, %v425_v43  ;;  %v504_v62 = vrot.slane %v1042_v51, 5  ;;  %v1427_v3 = vld [vmem:[%s1334_s27 + $0x18] sm:$0xe]  ;;  %v1431_v6 = vld [vmem:[%s1334_s27 + $0x1c] sm:$0x1] }
  0x2c   : > { %392 = vrot.lane.b32.xlu0 %v1031_v32, %s1262_s28  ;;  %v1052_v63 = vrot.slane %v1047_v52, 9  ;;  %v516_v2 = vrot.slane %v1048_v54, 5  ;;  %v1061_v5 = vld [vmem:[%s1334_s27 + $0x18] sm:$0xf]  ;;  %v1062_v7 = vld [vmem:[%s1334_s27 + $0x1c] sm:$0x1]  ;;  %v509_v22 = vsel %vm1342_vm4, %v1050_v58, %v508_v59 }
  0x2d   : > { %471 = vrot.lane.b32.xlu1 %v440_v48, %s1265_s13  ;;  %v468_v0 = vsel %vm1369_vm5, %v463_v53, %v467_v49  ;;  %v449_v1 = vrot.slane %v448_v56, 4  ;;  %v587_v8 = vshrl.u32 %v1061_v5, 16  ;;  %v590_v9 = vshll.u32 %v1061_v5, 16  ;;  %v1059_v10 = vld [vmem:[%s1334_s27 + $0x10] sm:$0xf]  ;;  %v1207_v34 = vld [vmem:[%s1587_s0 + $0x20] sm:$0xff]  }
  0x2e   : > { %v596_v11 = vshll.u32 %v1062_v7, 16  ;;  %v1060_v12 = vld [vmem:[%s1334_s27 + $0x14] sm:$0x1]  ;;  %v573_v13 = vshrl.u32 %v1059_v10, 16  ;;  %v576_v14 = vshll.u32 %v1059_v10, 16  ;;  %v1051_v25 = vrot.slane %v1427_v3, 9  ;;  %1114 = vmatpush3.bf16.msra.mxu0 %v1207_v34  ;;  %1146 = vmatpush3.bf16.msra.mxu1 %v1207_v34 }
  0x2f   : > { %v454_v16 = vsel %vm1369_vm5, %v449_v1, %v453_v57  ;;  %v589_v17 = vrot.slane %v587_v8, 4  ;;  %v592_v18 = vrot.slane %v590_v9, 5  ;;  %v582_v19 = vshll.u32 %v1060_v12, 16  ;;  %v1065_v20 = vld [vmem:[%s1334_s27 + $0x28] sm:$0xf]  ;;  %s1266_s30 = smov 80  }
  0x30   : > { %469 = vrot.lane.b32.xlu0 %v426_v60, %s1265_s13  ;;  %v1066_v23 = vld [vmem:[%s1334_s27 + $0x2c] sm:$0x1]  ;;  %v615_v24 = vshrl.u32 %v1065_v20, 16  ;;  %v618_v27 = vshll.u32 %v1065_v20, 16  ;;  %v1063_v28 = vld [vmem:[%s1334_s27 + $0x20] sm:$0xf]  ;;  %v505_v30 = vsel %vm1342_vm4, %v1049_v61, %v504_v62  ;;  %v517_v31 = vsel %vm1342_vm4, %v1052_v63, %v516_v2 }
  0x31   : > { %475 = vrot.lane.b32.xlu1 %v468_v0, %s1265_s13  ;;  %v593_v26 = vor.u32 %v592_v18, %v589_v17  ;;  %v512_v32 = vrot.slane %v1431_v6, 5  ;;  %v1461_v33 = vrot.slane %v596_v11, 5  ;;  %v575_v35 = vrot.slane %v573_v13, 4  ;;  %v233_v39 = vld [vmem:[%s1334_s27 + $0x10] sm:$0xf]  ;;  %v1208_v49 = vld [vmem:[%s1587_s0 + $0x58] sm:$0xff]  }
  0x32   : > { %v578_v36 = vrot.slane %v576_v14, 5  ;;  %v1467_v37 = vrot.slane %v582_v19, 5  ;;  %v624_v38 = vshll.u32 %v1066_v23, 16  ;;  %v617_v41 = vrot.slane %v615_v24, 4  ;;  %238 = vst.msk [vmem:[#allocation2 + $0x10] sm:$0xf] %vm235_vm6, %v233_v39  ;;  %1115 = vmatprep.subr.bf16.mxu0 %v1208_v49  ;;  %1139 = vmatprep.subr.bf16.mxu1 %v1208_v49 }
  0x33   : > { %v1470_v40 = vrot.slane %v593_v26, 4  ;;  %v601_v42 = vshrl.u32 %v1063_v28, 16  ;;  %v604_v43 = vshll.u32 %v1063_v28, 16  ;;  %v231_v45 = vld [vmem:[%s1334_s27] sm:$0xf]  ;;  %v620_v46 = vrot.slane %v618_v27, 5 }
  0x34   : > { %473 = vrot.lane.b32.xlu0 %v454_v16, %s1265_s13  ;;  %236 = vst.msk [vmem:[#allocation2] sm:$0xf] %vm235_vm6, %v231_v45  ;;  %v234_v47 = vld [vmem:[%s1334_s27 + $0x18] sm:$0xf]  ;;  %v232_v48 = vld [vmem:[%s1334_s27 + $0x8] sm:$0xf]  ;;  %v513_v51 = vsel %vm1342_vm4, %v1051_v25, %v512_v32  ;;  %v579_v58 = vor.u32 %v578_v36, %v575_v35 }
  0x35   : > { %520 = vrot.lane.b32.xlu1 %v509_v22, %s1266_s30  ;;  %v1056_v50 = vld [vmem:[%s1334_s27 + $0x18] sm:$0xf]  ;;  %239 = vst.msk [vmem:[#allocation2 + $0x18] sm:$0xf] %vm235_vm6, %v234_v47  ;;  %237 = vst.msk [vmem:[#allocation2 + $0x8] sm:$0xf] %vm235_vm6, %v232_v48  ;;  %v621_v62 = vor.u32 %v620_v46, %v617_v41  ;;  %v599_v16 = vsel %vm1369_vm5, %v1470_v40, %v1461_v33 }
  0x36   : > { %v1487_v52 = vrot.slane %v624_v38, 5  ;;  %v1490_v53 = vld [vmem:[%s1334_s27 + $0x24] sm:$0x1]  ;;  %v1209_v54 = vld [vmem:[%s1587_s0 + $0x18] sm:$0xff]   ;;  %v1495_v55 = vrot.slane %v601_v42, 4  ;;  %v1210_v56 = vld [vmem:[%s1587_s0 + $0x50] sm:$0xff]  }
  0x37   : > { %v1055_v57 = vld [vmem:[%s1334_s27 + $0x10] sm:$0xf]  ;;  %v606_v59 = vrot.slane %v604_v43, 5  ;;  %1116 = vmatpush3.bf16.msra.mxu0 %v1209_v54  ;;  %1147 = vmatpush3.bf16.msra.mxu1 %v1209_v54  ;;  %v1058_v61 = vld [vmem:[%s1334_s27 + $0x28] sm:$0xf]  ;;  %s1267_s13 = smov 96  }
  0x38   : > { %518 = vrot.lane.b32.xlu0 %v505_v30, %s1266_s30  ;;  %v1211_v60 = vld [vmem:[%s1587_s0 + $0x10] sm:$0xff]   ;;  %1117 = vmatprep.subr.bf16.mxu0 %v1210_v56  ;;  %v1212_v63 = vld [vmem:[%s1587_s0 + $0x48] sm:$0xff]   ;;  %v610_v0 = vshll.u32 %v1490_v53, 16  ;;  %v1057_v1 = vld [vmem:[%s1334_s27 + $0x20] sm:$0xf]  ;;  %v580_v2 = vrot.slane %v579_v58, 4 }
  0x39   : > { %524 = vrot.lane.b32.xlu1 %v517_v31, %s1266_s30  ;;  %1140 = vmatprep.subr.bf16.mxu1 %v1210_v56  ;;  %v1213_v3 = vld [vmem:[%s1587_s0 + $0x8] sm:$0xff]   ;;  %v1268_v5 = vmov 0   ;;  %v622_v6 = vrot.slane %v621_v62, 4  ;;  %v1214_v7 = vld [vmem:[%s1587_s0 + $0x40] sm:$0xff]   ;;  %v1067_v8 = vld [vmem:[%s1334_s27 + $0x10] sm:$0xe]  ;;  %v607_v10 = vor.u32 %v606_v59, %v1495_v55 }
  0x3a   : > { %224 = vst.msk [vmem:[#allocation2 + $0x4] sm:$0xf] %vm223_vm7, %v1268_v5  ;;  %225 = vst.msk [vmem:[#allocation2 + $0xc] sm:$0xf] %vm223_vm7, %v1268_v5  ;;  %v1068_v9 = vld [vmem:[%s1334_s27 + $0x14] sm:$0x1]  ;;  %v585_v29 = vsel %vm1369_vm5, %v580_v2, %v1467_v37 }
  0x3b   : > { %1118 = vmatpush3.bf16.msra.mxu0 %v1211_v60  ;;  %1148 = vmatpush3.bf16.msra.mxu1 %v1211_v60  ;;  %226 = vst.msk [vmem:[#allocation2 + $0x14] sm:$0xf] %vm223_vm7, %v1268_v5  ;;  %227 = vst.msk [vmem:[#allocation2 + $0x1c] sm:$0xf] %vm223_vm7, %v1268_v5  ;;  %v1215_v11 = vld [vmem:[%s1587_s0] sm:$0xff]   ;;  %v1075_v14 = vrot.slane %v1067_v8, 9  ;;  %v627_v33 = vsel %vm1369_vm5, %v622_v6, %v1487_v52 }
  0x3c   : > { %522 = vrot.lane.b32.xlu0 %v513_v51, %s1266_s30  ;;  %1119 = vmatprep.subr.bf16.mxu0 %v1212_v63  ;;  %v1069_v12 = vld [vmem:[%s1334_s27 + $0x18] sm:$0xe]  ;;  %v1070_v13 = vld [vmem:[%s1334_s27 + $0x1c] sm:$0x1]  ;;  %v663_v15 = vrot.slane %v1068_v9, 5  ;;  %s1269_s30 = smov 112  }
  0x3d   : > { %549 = vrot.lane.b32.xlu1 %v1056_v50, %s1267_s13  ;;  %1141 = vmatprep.subr.bf16.mxu1 %v1212_v63  ;;  %v1076_v17 = vrot.slane %v1069_v12, 9  ;;  %v667_v18 = vrot.slane %v1070_v13, 5  ;;  %v1071_v19 = vld [vmem:[%s1334_s27 + $0x20] sm:$0xe]  ;;  %v1072_v20 = vld [vmem:[%s1334_s27 + $0x24] sm:$0x1] }
  0x3e   : > { %v664_v21 = vsel %vm1342_vm4, %v1075_v14, %v663_v15  ;;  %v1073_v22 = vld [vmem:[%s1334_s27 + $0x28] sm:$0xe]  ;;  %v1074_v23 = vld [vmem:[%s1334_s27 + $0x2c] sm:$0x1]  ;;  %v1077_v24 = vrot.slane %v1071_v19, 9  ;;  %v671_v25 = vrot.slane %v1072_v20, 5 }
  0x3f   : > { %1120 = vmatpush3.bf16.msra.mxu0 %v1213_v3  ;;  %1149 = vmatpush3.bf16.msra.mxu1 %v1213_v3  ;;  %v668_v26 = vsel %vm1342_vm4, %v1076_v17, %v667_v18  ;;  %681 = vst.msk [vmem:[#allocation2 + $0x4] sm:$0xf] %vm235_vm6, %v664_v21  ;;  %v1078_v27 = vrot.slane %v1073_v22, 9  ;;  %v675_v28 = vrot.slane %v1074_v23, 5  ;;  %v608_v30 = vrot.slane %v607_v10, 4  ;;  %s1017_s27 = sshll.u32 %s1244_s15, 2 }
  0x40   : > { %547 = vrot.lane.b32.xlu0 %v1055_v57, %s1267_s13  ;;  %1121 = vmatprep.subr.bf16.mxu0 %v1214_v7  ;;  %v612_v31 = vrot.slane %v610_v0, 5  ;;  %682 = vst.msk [vmem:[#allocation2 + $0xc] sm:$0xf] %vm235_vm6, %v668_v26  ;;  %v672_v32 = vsel %vm1342_vm4, %v1077_v24, %v671_v25  ;;  %p214_p6 = scmp.lt.s32.totalorder %s1017_s27, 7  ;;  %v1099_v6 = vld [vmem:[%s1589_s2] ss:$0 sm:$0xff] }
  0x41   : > { %553 = vrot.lane.b32.xlu1 %v1058_v61, %s1267_s13  ;;  %1142 = vmatprep.subr.bf16.mxu1 %v1214_v7  ;;  %v676_v34 = vsel %vm1342_vm4, %v1078_v27, %v675_v28  ;;  %683 = vst.msk [vmem:[#allocation2 + $0x14] sm:$0xf] %vm235_vm6, %v672_v32  ;;  %v1100_v8 = vld [vmem:[%s1590_s3] ss:$0 sm:$0xff] }
  0x42   : > { %684 = vst.msk [vmem:[#allocation2 + $0x1c] sm:$0xf] %vm235_vm6, %v676_v34  ;;  %v613_v35 = vsel %vm1369_vm5, %v608_v30, %v612_v31  ;;  %s1609_s27 = smov (!%p214_p6, %s1017_s27), 7 }
  0x43   : > { %1122 = vmatpush3.bf16.msra.mxu0 %v1215_v11  ;;  %1150 = vmatpush3.bf16.msra.mxu1 %v1215_v11  ;;  %s217_s6 = sadd.s32 %s1018_s5, %s1609_s27 }
  0x44   : > { %551 = vrot.lane.b32.xlu0 %v1057_v1, %s1267_s13  ;;  %s1019_s11 = sshll.u32 %s217_s6, 3 }
  0x45   : > { %630 = vrot.lane.b32.xlu1 %v599_v16, %s1269_s30  ;;  %s219_s12 = scalar_lea.vmem %s1591_s4, %s1019_s11 }
  0x47   : > { %v1218_v0 = vld [vmem:[#allocation2 + $0x4] ss:$8 sps:$4 sm:$0xff]  }
  0x48   : > { %628 = vrot.lane.b32.xlu0 %v585_v29, %s1269_s30  ;;  %869 = vmatprep.mubr.bf16.mxu0 %v1218_v0 }
  0x49   : > { %634 = vrot.lane.b32.xlu1 %v627_v33, %s1269_s30  ;;  %v1221_v2 = vld [vmem:[#allocation2 + $0x14] ss:$8 sps:$4 sm:$0xff]  }
  0x4a   : > { %877 = vmatprep.mubr.bf16.mxu1 %v1221_v2 }
  0x4c   : > { %632 = vrot.lane.b32.xlu0 %v613_v35, %s1269_s30 }
  0x86   : > { %v391_v36 = vpop.permute.xlu1 %390  ;;  %v389_v37 = vpop.permute.xlu0 %388 }
  0x8a   : > { %v362_v38 = vpop.permute.xlu1 %361 }
  0x8b   : > { %v360_v39 = vpop.permute.xlu0 %359 }
  0x8e   : > { %v366_v40 = vpop.permute.xlu1 %365 }
  0x8f   : > { %v364_v41 = vpop.permute.xlu0 %363 }
  0x93   : > { %v312_v4 = vpop.permute.xlu1 %311 }
  0x94   : > { %322 = vst.msk [vmem:[#allocation2 + $0x10] sm:$0xf] %vm319_vm8, %v312_v4 }
  0x95   : > { %374 = vst.msk [vmem:[#allocation2 + $0x10] sm:$0xf] %vm371_vm9, %v364_v41 }
  0x96   : > { %v308_v42 = vpop.permute.xlu0 %307 }
  0x97   : > { %320 = vst.msk [vmem:[#allocation2] sm:$0xf] %vm319_vm8, %v308_v42  ;;  %v314_v43 = vpop.permute.xlu1 %313 }
  0x98   : > { %372 = vst.msk [vmem:[#allocation2] sm:$0xf] %vm371_vm9, %v360_v39 }
  0x99   : > { %323 = vst.msk [vmem:[#allocation2 + $0x18] sm:$0xf] %vm319_vm8, %v314_v43 }
  0x9a   : > { %375 = vst.msk [vmem:[#allocation2 + $0x18] sm:$0xf] %vm371_vm9, %v366_v40  ;;  %v310_v44 = vpop.permute.xlu0 %309 }
  0x9b   : > { %401 = vst.msk [vmem:[#allocation2] sm:$0xf] %vm400_vm10, %v389_v37  ;;  %v395_v45 = vpop.permute.xlu1 %394 }
  0x9c   : > { %321 = vst.msk [vmem:[#allocation2 + $0x8] sm:$0xf] %vm319_vm8, %v310_v44 }
  0x9d   : > { %373 = vst.msk [vmem:[#allocation2 + $0x8] sm:$0xf] %vm371_vm9, %v362_v38 }
  0x9e   : > { %404 = vst.msk [vmem:[#allocation2 + $0x18] sm:$0xf] %vm400_vm10, %v395_v45  ;;  %402 = vst.msk [vmem:[#allocation2 + $0x8] sm:$0xf] %vm400_vm10, %v391_v36  ;;  %v393_v46 = vpop.permute.xlu0 %392 }
  0x9f   : > { %403 = vst.msk [vmem:[#allocation2 + $0x10] sm:$0xf] %vm400_vm10, %v393_v46  ;;  %v472_v47 = vpop.permute.xlu1 %471 }
  0xa0   : > { %483 = vst.msk [vmem:[#allocation2 + $0x8] sm:$0xf] %vm481_vm11, %v472_v47 }
  0xa2   : > { %v470_v48 = vpop.permute.xlu0 %469 }
  0xa3   : > { %482 = vst.msk [vmem:[#allocation2] sm:$0xf] %vm481_vm11, %v470_v48  ;;  %v476_v49 = vpop.permute.xlu1 %475 }
  0xa4   : > { %485 = vst.msk [vmem:[#allocation2 + $0x18] sm:$0xf] %vm481_vm11, %v476_v49 }
  0xa6   : > { %v474_v50 = vpop.permute.xlu0 %473 }
  0xa7   : > { %484 = vst.msk [vmem:[#allocation2 + $0x10] sm:$0xf] %vm481_vm11, %v474_v50  ;;  %v521_v51 = vpop.permute.xlu1 %520 }
  0xa8   : > { %532 = vst.msk [vmem:[#allocation2 + $0x8] sm:$0xf] %vm530_vm12, %v521_v51 }
  0xaa   : > { %v519_v52 = vpop.permute.xlu0 %518 }
  0xab   : > { %531 = vst.msk [vmem:[#allocation2] sm:$0xf] %vm530_vm12, %v519_v52  ;;  %v525_v53 = vpop.permute.xlu1 %524 }
  0xac   : > { %534 = vst.msk [vmem:[#allocation2 + $0x18] sm:$0xf] %vm530_vm12, %v525_v53 }
  0xae   : > { %v523_v54 = vpop.permute.xlu0 %522 }
  0xaf   : > { %533 = vst.msk [vmem:[#allocation2 + $0x10] sm:$0xf] %vm530_vm12, %v523_v54  ;;  %v550_v55 = vpop.permute.xlu1 %549 }
  0xb0   : > { %561 = vst.msk [vmem:[#allocation2 + $0x8] sm:$0xf] %vm559_vm13, %v550_v55 }
  0xb2   : > { %v548_v56 = vpop.permute.xlu0 %547 }
  0xb3   : > { %560 = vst.msk [vmem:[#allocation2] sm:$0xf] %vm559_vm13, %v548_v56  ;;  %v554_v57 = vpop.permute.xlu1 %553 }
  0xb4   : > { %563 = vst.msk [vmem:[#allocation2 + $0x18] sm:$0xf] %vm559_vm13, %v554_v57 }
  0xb6   : > { %v552_v58 = vpop.permute.xlu0 %551 }
  0xb7   : > { %562 = vst.msk [vmem:[#allocation2 + $0x10] sm:$0xf] %vm559_vm13, %v552_v58  ;;  %v631_v59 = vpop.permute.xlu1 %630 }
  0xb8   : > { %642 = vst.msk [vmem:[#allocation2 + $0x8] sm:$0xf] %vm640_vm14, %v631_v59 }
  0xba   : > { %v629_v60 = vpop.permute.xlu0 %628 }
  0xbb   : > { %641 = vst.msk [vmem:[#allocation2] sm:$0xf] %vm640_vm14, %v629_v60  ;;  %v635_v61 = vpop.permute.xlu1 %634 }
  0xbc   : > { %644 = vst.msk [vmem:[#allocation2 + $0x18] sm:$0xf] %vm640_vm14, %v635_v61 }
  0xbe   : > { %v633_v62 = vpop.permute.xlu0 %632 }
  0xbf   : > { %643 = vst.msk [vmem:[#allocation2 + $0x10] sm:$0xf] %vm640_vm14, %v633_v62 }
  0xc2   : > { %v1216_v63 = vld [vmem:[#allocation2] ss:$8 sps:$4 sm:$0xff]  }
  0xc3   : > { %870 = vmatmul.mubr.bf16.vlgmr.msra.gmra.mxu0 %v1216_v63 }
  0xc6   : > { %v1219_v1 = vld [vmem:[#allocation2 + $0x10] ss:$8 sps:$4 sm:$0xff]  }
  0xc7   : > { %878 = vmatmul.mubr.bf16.vlgmr.msra.gmra.mxu1 %v1219_v1 }
 0x183   : > { %v1123_v3 = vpop.f32.mrf.mxu0 }
 0x185   : > { %v1124_v5 = vpop.f32.mrf.mxu0 }
 0x186   : > { %v1125_v7 = vadd.f32 %v1124_v5, %v1123_v3 }
 0x187   : > { %v1126_v9 = vpop.f32.mrf.mxu0  ;;  %v1129_v10 = vpop.f32.mrf.mxu1 }
 0x188   : > { %v893_v11 = vmul.f32 %v1125_v7, %v1099_v6 }
 0x189   : > { %v1127_v12 = vpop.f32.mrf.mxu0  ;;  %v1130_v13 = vpop.f32.mrf.mxu1 }
 0x18a   : > { %v904_v14 = vadd.f32 %v1100_v8, %v893_v11  ;;  %v1128_v15 = vadd.f32 %v1127_v12, %v1126_v9  ;;  %v1131_v16 = vadd.f32 %v1130_v13, %v1129_v10 }
 0x18b   : > { %v1132_v17 = vpop.f32.mrf.mxu1 }
 0x18c   : > { %v908_v18 = vmax.f32 %v904_v14, 0.0  ;;  %v894_v19 = vmul.f32 %v1128_v15, %v1099_v6  ;;  %v895_v20 = vmul.f32 %v1131_v16, %v1099_v6 }
 0x18d   : > { %v1133_v21 = vpop.f32.mrf.mxu1 }
 0x18e   : > { %913 = vst.msk [vmem:[%s219_s12] sm:$0xff] %vm912_vm15, %v908_v18  ;;  %v905_v22 = vadd.f32 %v1100_v8, %v894_v19  ;;  %v906_v23 = vadd.f32 %v1100_v8, %v895_v20  ;;  %v1134_v24 = vadd.f32 %v1133_v21, %v1132_v17 }
 0x190   : > { %v909_v25 = vmax.f32 %v905_v22, 0.0  ;;  %v910_v26 = vmax.f32 %v906_v23, 0.0  ;;  %v896_v27 = vmul.f32 %v1134_v24, %v1099_v6 }
 0x192   : > { %914 = vst.msk [vmem:[%s219_s12 + $0x8] sm:$0xff] %vm912_vm15, %v909_v25  ;;  %915 = vst.msk [vmem:[%s219_s12 + $0x10] sm:$0xff] %vm912_vm15, %v910_v26  ;;  %v907_v28 = vadd.f32 %v1100_v8, %v896_v27 }
 0x194   : > { %v911_v29 = vmax.f32 %v907_v28, 0.0 }
 0x196   : > { %916 = vst.msk [vmem:[%s219_s12 + $0x18] sm:$0xff] %vm912_vm15, %v911_v29 }
 0x197 PF: > { %s14_s19 = sadd.s32 1, %s1260_s19   ;;  %s1596_s15 = smov %s1252_s17 }
 0x198   : > { %p11_p7 = scmp.ge.s32.totalorder %s14_s19, 6   ;;  %s1597_s16 = smov %s1256_s18 }
 0x199   : > { %s1598_s17 = smov %s1601_s20  ;;  %s1599_s18 = smov %s1605_s21 }
 0x19a   :  { %13 = sbr.rel (!%p11_p7) target bundleno = 3 (0x3), region = 69 }

</bundles_post_ra>
